<compile_context>
chip_gen: v6e
topology: v6e:2x2x1
jax: 0.10.0
libtpu: 0.0.40
codegen_flags: <defaults>
</compile_context>

<pallas_src>
import jax
import jax.numpy as jnp
from jax.experimental import pallas as pl
from jax.experimental.pallas import tpu as pltpu

# parameters_qubit.u_max is external config; fixed deterministically here.
U_MAX = 2.0
STD = 0.01


def _round_up(x, m):
    return (x + m - 1) // m * m


def policy_kernel(x_ref, w1_ref, w256_ref, w128_ref, vec_ref, mu_ref):
    """Feature-major MLP: activations are (features, TM) with batch on lanes."""
    f32 = jnp.float32
    bf16 = jnp.bfloat16
    relu = lambda v: jnp.maximum(v, 0.0)

    # ---- unpack the f32 bias / vector slab (static, column-per-tensor) ----
    b1  = vec_ref[0:384, 0:1]     # [bs1 ; ba1]  for the fused layer-1
    bs2 = vec_ref[0:256, 1:2]
    bs3 = vec_ref[0:128, 2:3]
    ba2 = vec_ref[0:128, 3:4]
    bc1 = vec_ref[0:64,  4:5]
    bc2 = vec_ref[0:32,  5:6]
    wc3 = vec_ref[0:32,  6:7]     # net_combine layer-3 weight (N == 1)
    bc3 = vec_ref[0:1,   7:8]

    # ---- fused layer 1: [net_state L1 ; net_action L1] ----
    # x rows: [state features ; last_alpha ; zero pad]; the 1/u_max pre-scale is
    # already folded into the action rows of w1, so alpha is used raw.
    x = x_ref[...].astype(bf16)                                    # (din_pad, TM)
    y1 = relu(jnp.dot(w1_ref[...], x, preferred_element_type=f32) + b1)  # (384, TM)
    h = y1[0:256, :].astype(bf16)                                  # net_state branch
    g = y1[256:384, :].astype(bf16)                                # net_action branch

    # ---- net_state: 256 -> 256 -> 128 ----
    h2 = relu(jnp.dot(w256_ref[0:256, :], h, preferred_element_type=f32) + bs2)
    d1 = relu(jnp.dot(w256_ref[256:384, :], h2.astype(bf16),
                      preferred_element_type=f32) + bs3)           # (128, TM)

    # ---- net_action: 128 -> 128 ----
    d2 = relu(jnp.dot(w128_ref[0:128, :], g, preferred_element_type=f32) + ba2)

    # ---- net_combine: 128 -> 64 -> 32 -> 1 ----
    s = (d1 + d2).astype(bf16)                                     # (128, TM)
    c1 = relu(jnp.dot(w128_ref[128:192, :], s, preferred_element_type=f32) + bc1)
    c2 = relu(jnp.dot(w128_ref[192:224, 0:64], c1.astype(bf16),
                      preferred_element_type=f32) + bc2)           # (32, TM)
    # N=1 final layer: elementwise multiply + sublane reduction -> lane-dense row.
    dalpha = jnp.sum(c2 * wc3, axis=0, keepdims=True) + bc3        # (1, TM)

    # mu = u_max * softsign(dalpha); reciprocal on the EUP. The clamp guards the
    # approximate reciprocal and matches torch.clamp in the reference module.
    mu = (U_MAX * dalpha) * pl.reciprocal(1.0 + jnp.abs(dalpha), approx=True)
    mu_ref[...] = jnp.clip(mu, -U_MAX, U_MAX)                      # (1, TM) lane-dense


def make_params(dim, key):
    """PyTorch nn.Linear default init: U(-1/sqrt(fan_in), +1/sqrt(fan_in)).
    Weights stored transposed vs. torch: (in_features, out_features)."""
    sizes = [
        (2 * dim, 256), (256, 256), (256, 128),   # net_state
        (1, 128), (128, 128),                     # net_action
        (128, 64), (64, 32), (32, 1),             # net_combine
    ]
    raw = []
    for fin, fout in sizes:
        key, kw, kb = jax.random.split(key, 3)
        bound = 1.0 / (fin ** 0.5)
        w = jax.random.uniform(kw, (fin, fout), jnp.float32, -bound, bound)
        b = jax.random.uniform(kb, (fout,), jnp.float32, -bound, bound)
        raw.append((w, b))
    return raw


def pack_params(dim, raw):
    """Consolidate the 16 per-layer tensors into 4 kernel inputs (feature-major):
       w1  : bf16 (384, din_pad)  fused [net_state L1 ; net_action L1 * (1/u_max)]
       w256: bf16 (384, 256)      [ws2^T ; ws3^T]
       w128: bf16 (224, 128)      [wa2^T ; wc1^T ; wc2^T (lanes 0:64 valid)]
       vec : f32  (384, 8)        one bias/vector per column
    """
    (ws1, bs1), (ws2, bs2), (ws3, bs3), (wa1, ba1), (wa2, ba2), \
        (wc1, bc1), (wc2, bc2), (wc3, bc3) = raw
    din = 2 * dim
    din_pad = _round_up(din + 1, 16)              # +1 row carries last_alpha

    w1 = jnp.zeros((384, din_pad), jnp.float32)
    w1 = w1.at[0:256, 0:din].set(ws1.T)           # net_state layer 1
    w1 = w1.at[256:384, din].set(wa1[0, :] / U_MAX)  # net_action layer 1, prescaled
    w1 = w1.astype(jnp.bfloat16)

    w256 = jnp.concatenate([ws2.T, ws3.T], axis=0).astype(jnp.bfloat16)   # (384, 256)

    wc2t = jnp.zeros((32, 128), jnp.float32).at[:, 0:64].set(wc2.T)
    w128 = jnp.concatenate([wa2.T, wc1.T, wc2t], axis=0).astype(jnp.bfloat16)  # (224,128)

    def col(v):
        v = jnp.ravel(v).astype(jnp.float32)
        return jnp.zeros((384,), jnp.float32).at[: v.shape[0]].set(v)

    vec = jnp.stack([
        col(jnp.concatenate([bs1, ba1])),         # b1 for the fused layer-1
        col(bs2), col(bs3), col(ba2),
        col(bc1), col(bc2),
        col(wc3), col(bc3),
    ], axis=1)                                    # (384, 8) f32
    return w1, w256, w128, vec, din, din_pad


def policy_forward(state, last_alpha, packed):
    w1, w256, w128, vec, din, din_pad = packed
    B = state.shape[0]

    # Batch tile: large tiles amortize the ~0.35 us per-grid-step overhead; for
    # big batches keep >= 2 tiles so v7x's two TensorCores both get work.
    TM_MAX = 1024
    if B <= 512:
        TM = _round_up(max(B, 1), 8)              # single grid step
    else:
        TM = min(TM_MAX, _round_up((B + 1) // 2, 256))
    Bp = _round_up(B, TM)
    grid = Bp // TM

    # Feature-major input slab: rows = [state features ; last_alpha ; zero pad],
    # columns = batch (lane-dense input DMA).  Padded batch columns are zeros
    # and their (bias-driven) outputs are discarded below.
    x = jnp.zeros((din_pad, Bp), jnp.float32)
    x = x.at[0:din, 0:B].set(state.T)
    x = x.at[din, 0:B].set(jnp.ravel(last_alpha))

    resident = lambda arr: pl.BlockSpec(arr.shape, lambda i: (0, 0))  # VMEM-resident
    mu = pl.pallas_call(
        policy_kernel,
        out_shape=jax.ShapeDtypeStruct((1, Bp), jnp.float32),
        grid_spec=pltpu.PrefetchScalarGridSpec(
            num_scalar_prefetch=0,
            grid=(grid,),
            in_specs=[
                pl.BlockSpec((din_pad, TM), lambda i: (0, i)),
                resident(w1), resident(w256), resident(w128), resident(vec),
            ],
            out_specs=pl.BlockSpec((1, TM), lambda i: (0, i)),   # lane-dense output
        ),
        compiler_params=pltpu.CompilerParams(
            dimension_semantics=("parallel",),    # batch tiles shard across TCs on v7x
        ),
    )(x, w1, w256, w128, vec)

    # torch's .squeeze() would collapse B == 1 to a scalar; keep the batch dim.
    return mu[0, :B], jnp.asarray(STD * U_MAX, jnp.float32)


def policy_reference(state, last_alpha, raw):
    """Pure-JAX f32 reference of the PyTorch forward pass (for validation)."""
    relu = lambda v: jnp.maximum(v, 0.0)
    (ws1, bs1), (ws2, bs2), (ws3, bs3), (wa1, ba1), (wa2, ba2), \
        (wc1, bc1), (wc2, bc2), (wc3, bc3) = raw
    h = relu(state @ ws1 + bs1)
    h = relu(h @ ws2 + bs2)
    d1 = relu(h @ ws3 + bs3)
    a = last_alpha / U_MAX
    g = relu(a @ wa1 + ba1)
    d2 = relu(g @ wa2 + ba2)
    c = relu((d1 + d2) @ wc1 + bc1)
    c = relu(c @ wc2 + bc2)
    dalpha = c @ wc3 + bc3
    mu = U_MAX * (dalpha / (1.0 + jnp.abs(dalpha)))
    return jnp.squeeze(jnp.clip(mu, -U_MAX, U_MAX), axis=-1)


if __name__ == "__main__":
    dim = 4          # state has 2*dim = 8 features

    key = jax.random.PRNGKey(0)
    key, kp = jax.random.split(key)
    raw = make_params(dim, kp)
    packed = pack_params(dim, raw)

    # batch=8 exercises the single-tile path; batch=640 exercises the gridded
    # (2 x 512) "parallel" path used for large batches.
    for batch in (8, 640):
        key, ks, ka = jax.random.split(key, 3)
        state = jax.random.normal(ks, (batch, 2 * dim), jnp.float32)
        last_alpha = jax.random.normal(ka, (batch, 1), jnp.float32)

        mu, std = policy_forward(state, last_alpha, packed)
        jax.block_until_ready((mu, std))

        assert mu.shape == (batch,)
        assert bool(jnp.all(jnp.abs(mu) <= U_MAX + 1e-6))
        mu_ref = policy_reference(state, last_alpha, raw)
        # bf16 matmuls + approx reciprocal => loose tolerance vs. the f32 reference.
        assert bool(jnp.max(jnp.abs(mu - mu_ref)) <= 0.15)

    print("KERNEL_OK")
</pallas_src>

<mosaic_0001>
module attributes {stable_mosaic.version = 11 : i64} {
  func.func @policy_kernel(%arg0: i32, %arg1: memref<16x8xf32, #tpu.memory_space<vmem>>, %arg2: memref<384x16xbf16, #tpu.memory_space<vmem>>, %arg3: memref<384x256xbf16, #tpu.memory_space<vmem>>, %arg4: memref<224x128xbf16, #tpu.memory_space<vmem>>, %arg5: memref<384x8xf32, #tpu.memory_space<vmem>>, %arg6: memref<1x8xf32, #tpu.memory_space<vmem>>) attributes {dimension_semantics = [#tpu.dimension_semantics<parallel>], iteration_bounds = array<i64: 1>, scalar_prefetch = 0 : i64, scratch_operands = 0 : i64, tpu.core_type = #tpu.core_type<tc>, window_params = [{transform_indices = @transform_0, window_bounds = array<i64: 16, 8>}, {pipeline_mode = #tpu.pipeline_mode<synchronous>, transform_indices = @transform_1, window_bounds = array<i64: 384, 16>}, {pipeline_mode = #tpu.pipeline_mode<synchronous>, transform_indices = @transform_2, window_bounds = array<i64: 384, 256>}, {pipeline_mode = #tpu.pipeline_mode<synchronous>, transform_indices = @transform_3, window_bounds = array<i64: 224, 128>}, {pipeline_mode = #tpu.pipeline_mode<synchronous>, transform_indices = @transform_4, window_bounds = array<i64: 384, 8>}, {transform_indices = @transform_5, window_bounds = array<i64: 1, 8>}]} {
    %c0 = arith.constant 0 : index
    %c0_0 = arith.constant 0 : index
    %0 = vector.load %arg5[%c0, %c0_0] : memref<384x8xf32, #tpu.memory_space<vmem>>, vector<384x1xf32>
    %c0_1 = arith.constant 0 : index
    %c1 = arith.constant 1 : index
    %1 = vector.load %arg5[%c0_1, %c1] : memref<384x8xf32, #tpu.memory_space<vmem>>, vector<256x1xf32>
    %c0_2 = arith.constant 0 : index
    %c2 = arith.constant 2 : index
    %2 = vector.load %arg5[%c0_2, %c2] : memref<384x8xf32, #tpu.memory_space<vmem>>, vector<128x1xf32>
    %c0_3 = arith.constant 0 : index
    %c3 = arith.constant 3 : index
    %3 = vector.load %arg5[%c0_3, %c3] : memref<384x8xf32, #tpu.memory_space<vmem>>, vector<128x1xf32>
    %c0_4 = arith.constant 0 : index
    %c4 = arith.constant 4 : index
    %4 = vector.load %arg5[%c0_4, %c4] : memref<384x8xf32, #tpu.memory_space<vmem>>, vector<64x1xf32>
    %c0_5 = arith.constant 0 : index
    %c5 = arith.constant 5 : index
    %5 = vector.load %arg5[%c0_5, %c5] : memref<384x8xf32, #tpu.memory_space<vmem>>, vector<32x1xf32>
    %c0_6 = arith.constant 0 : index
    %c6 = arith.constant 6 : index
    %6 = vector.load %arg5[%c0_6, %c6] : memref<384x8xf32, #tpu.memory_space<vmem>>, vector<32x1xf32>
    %c0_7 = arith.constant 0 : index
    %c7 = arith.constant 7 : index
    %7 = vector.load %arg5[%c0_7, %c7] : memref<384x8xf32, #tpu.memory_space<vmem>>, vector<1x1xf32>
    %c0_8 = arith.constant 0 : index
    %c0_9 = arith.constant 0 : index
    %8 = vector.load %arg1[%c0_8, %c0_9] : memref<16x8xf32, #tpu.memory_space<vmem>>, vector<16x8xf32>
    %9 = arith.truncf %8 : vector<16x8xf32> to vector<16x8xbf16>
    %c0_10 = arith.constant 0 : index
    %c0_11 = arith.constant 0 : index
    %10 = vector.load %arg2[%c0_10, %c0_11] : memref<384x16xbf16, #tpu.memory_space<vmem>>, vector<384x16xbf16>
    %cst = arith.constant dense<0.000000e+00> : vector<384x8xf32>
    %11 = tpu.matmul %10, %9, %cst {dimension_numbers = #tpu.dot_dimension_numbers<[1], [0], [0], [1], [0, 0, 1, 1], [], []>} : vector<384x16xbf16>, vector<16x8xbf16>, vector<384x8xf32> -> vector<384x8xf32>
    %12 = vector.broadcast %0 : vector<384x1xf32> to vector<384x8xf32>
    %13 = arith.addf %11, %12 : vector<384x8xf32>
    %cst_12 = arith.constant 0.000000e+00 : f32
    %14 = vector.broadcast %cst_12 : f32 to vector<384x8xf32>
    %15 = arith.maximumf %13, %14 : vector<384x8xf32>
    %16 = vector.extract_strided_slice %15 {offsets = [0, 0], sizes = [256, 8], strides = [1, 1]} : vector<384x8xf32> to vector<256x8xf32>
    %17 = arith.truncf %16 : vector<256x8xf32> to vector<256x8xbf16>
    %18 = vector.extract_strided_slice %15 {offsets = [256, 0], sizes = [128, 8], strides = [1, 1]} : vector<384x8xf32> to vector<128x8xf32>
    %19 = arith.truncf %18 : vector<128x8xf32> to vector<128x8xbf16>
    %c0_13 = arith.constant 0 : index
    %c0_14 = arith.constant 0 : index
    %20 = vector.load %arg3[%c0_13, %c0_14] : memref<384x256xbf16, #tpu.memory_space<vmem>>, vector<256x256xbf16>
    %cst_15 = arith.constant dense<0.000000e+00> : vector<256x8xf32>
    %21 = tpu.matmul %20, %17, %cst_15 {dimension_numbers = #tpu.dot_dimension_numbers<[1], [0], [0], [1], [0, 0, 1, 1], [], []>} : vector<256x256xbf16>, vector<256x8xbf16>, vector<256x8xf32> -> vector<256x8xf32>
    %22 = vector.broadcast %1 : vector<256x1xf32> to vector<256x8xf32>
    %23 = arith.addf %21, %22 : vector<256x8xf32>
    %cst_16 = arith.constant 0.000000e+00 : f32
    %24 = vector.broadcast %cst_16 : f32 to vector<256x8xf32>
    %25 = arith.maximumf %23, %24 : vector<256x8xf32>
    %c256 = arith.constant 256 : index
    %c0_17 = arith.constant 0 : index
    %26 = vector.load %arg3[%c256, %c0_17] : memref<384x256xbf16, #tpu.memory_space<vmem>>, vector<128x256xbf16>
    %27 = arith.truncf %25 : vector<256x8xf32> to vector<256x8xbf16>
    %cst_18 = arith.constant dense<0.000000e+00> : vector<128x8xf32>
    %28 = tpu.matmul %26, %27, %cst_18 {dimension_numbers = #tpu.dot_dimension_numbers<[1], [0], [0], [1], [0, 0, 1, 1], [], []>} : vector<128x256xbf16>, vector<256x8xbf16>, vector<128x8xf32> -> vector<128x8xf32>
    %29 = vector.broadcast %2 : vector<128x1xf32> to vector<128x8xf32>
    %30 = arith.addf %28, %29 : vector<128x8xf32>
    %cst_19 = arith.constant 0.000000e+00 : f32
    %31 = vector.broadcast %cst_19 : f32 to vector<128x8xf32>
    %32 = arith.maximumf %30, %31 : vector<128x8xf32>
    %c0_20 = arith.constant 0 : index
    %c0_21 = arith.constant 0 : index
    %33 = vector.load %arg4[%c0_20, %c0_21] : memref<224x128xbf16, #tpu.memory_space<vmem>>, vector<128x128xbf16>
    %cst_22 = arith.constant dense<0.000000e+00> : vector<128x8xf32>
    %34 = tpu.matmul %33, %19, %cst_22 {dimension_numbers = #tpu.dot_dimension_numbers<[1], [0], [0], [1], [0, 0, 1, 1], [], []>} : vector<128x128xbf16>, vector<128x8xbf16>, vector<128x8xf32> -> vector<128x8xf32>
    %35 = vector.broadcast %3 : vector<128x1xf32> to vector<128x8xf32>
    %36 = arith.addf %34, %35 : vector<128x8xf32>
    %cst_23 = arith.constant 0.000000e+00 : f32
    %37 = vector.broadcast %cst_23 : f32 to vector<128x8xf32>
    %38 = arith.maximumf %36, %37 : vector<128x8xf32>
    %39 = arith.addf %32, %38 : vector<128x8xf32>
    %40 = arith.truncf %39 : vector<128x8xf32> to vector<128x8xbf16>
    %c128 = arith.constant 128 : index
    %c0_24 = arith.constant 0 : index
    %41 = vector.load %arg4[%c128, %c0_24] : memref<224x128xbf16, #tpu.memory_space<vmem>>, vector<64x128xbf16>
    %cst_25 = arith.constant dense<0.000000e+00> : vector<64x8xf32>
    %42 = tpu.matmul %41, %40, %cst_25 {dimension_numbers = #tpu.dot_dimension_numbers<[1], [0], [0], [1], [0, 0, 1, 1], [], []>} : vector<64x128xbf16>, vector<128x8xbf16>, vector<64x8xf32> -> vector<64x8xf32>
    %43 = vector.broadcast %4 : vector<64x1xf32> to vector<64x8xf32>
    %44 = arith.addf %42, %43 : vector<64x8xf32>
    %cst_26 = arith.constant 0.000000e+00 : f32
    %45 = vector.broadcast %cst_26 : f32 to vector<64x8xf32>
    %46 = arith.maximumf %44, %45 : vector<64x8xf32>
    %c192 = arith.constant 192 : index
    %c0_27 = arith.constant 0 : index
    %47 = vector.load %arg4[%c192, %c0_27] : memref<224x128xbf16, #tpu.memory_space<vmem>>, vector<32x64xbf16>
    %48 = arith.truncf %46 : vector<64x8xf32> to vector<64x8xbf16>
    %cst_28 = arith.constant dense<0.000000e+00> : vector<32x8xf32>
    %49 = tpu.matmul %47, %48, %cst_28 {dimension_numbers = #tpu.dot_dimension_numbers<[1], [0], [0], [1], [0, 0, 1, 1], [], []>} : vector<32x64xbf16>, vector<64x8xbf16>, vector<32x8xf32> -> vector<32x8xf32>
    %50 = vector.broadcast %5 : vector<32x1xf32> to vector<32x8xf32>
    %51 = arith.addf %49, %50 : vector<32x8xf32>
    %cst_29 = arith.constant 0.000000e+00 : f32
    %52 = vector.broadcast %cst_29 : f32 to vector<32x8xf32>
    %53 = arith.maximumf %51, %52 : vector<32x8xf32>
    %54 = vector.broadcast %6 : vector<32x1xf32> to vector<32x8xf32>
    %55 = arith.mulf %53, %54 : vector<32x8xf32>
    %cst_30 = arith.constant dense<0.000000e+00> : vector<8xf32>
    %56 = vector.multi_reduction <add>, %55, %cst_30 [0] : vector<32x8xf32> to vector<8xf32>
    %57 = vector.shape_cast %56 : vector<8xf32> to vector<1x8xf32>
    %58 = vector.broadcast %7 : vector<1x1xf32> to vector<1x8xf32>
    %59 = arith.addf %57, %58 : vector<1x8xf32>
    %cst_31 = arith.constant 2.000000e+00 : f32
    %60 = vector.broadcast %cst_31 : f32 to vector<1x8xf32>
    %61 = arith.mulf %60, %59 : vector<1x8xf32>
    %62 = math.absf %59 : vector<1x8xf32>
    %cst_32 = arith.constant 1.000000e+00 : f32
    %63 = vector.broadcast %cst_32 : f32 to vector<1x8xf32>
    %64 = arith.addf %63, %62 : vector<1x8xf32>
    %65 = tpu.reciprocal %64 {approx = true} : vector<1x8xf32> -> vector<1x8xf32>
    %66 = arith.mulf %61, %65 : vector<1x8xf32>
    %cst_33 = arith.constant -2.000000e+00 : f32
    %cst_34 = arith.constant 2.000000e+00 : f32
    %67 = vector.broadcast %cst_33 : f32 to vector<1x8xf32>
    %68 = arith.maximumf %67, %66 : vector<1x8xf32>
    %69 = vector.broadcast %cst_34 : f32 to vector<1x8xf32>
    %70 = arith.minimumf %69, %68 : vector<1x8xf32>
    %c0_35 = arith.constant 0 : index
    %c0_36 = arith.constant 0 : index
    %71 = vector.load %arg6[%c0_35, %c0_36] : memref<1x8xf32, #tpu.memory_space<vmem>>, vector<1x8xf32>
    tpu.vector_store %arg6[%c0_35, %c0_36], %70 {strides = array<i32>} : memref<1x8xf32, #tpu.memory_space<vmem>>, vector<1x8xf32>,
    return
  }
  func.func @transform_0(%arg0: i32) -> (i32, i32) {
    %c0_i32 = arith.constant 0 : i32
    %c0_i32_0 = arith.constant 0 : i32
    return %c0_i32, %arg0 : i32, i32
  }
  func.func @transform_1(%arg0: i32) -> (i32, i32) {
    %c0_i32 = arith.constant 0 : i32
    %c0_i32_0 = arith.constant 0 : i32
    %c0_i32_1 = arith.constant 0 : i32
    return %c0_i32, %c0_i32_0 : i32, i32
  }
  func.func @transform_2(%arg0: i32) -> (i32, i32) {
    %c0_i32 = arith.constant 0 : i32
    %c0_i32_0 = arith.constant 0 : i32
    %c0_i32_1 = arith.constant 0 : i32
    return %c0_i32, %c0_i32_0 : i32, i32
  }
  func.func @transform_3(%arg0: i32) -> (i32, i32) {
    %c0_i32 = arith.constant 0 : i32
    %c0_i32_0 = arith.constant 0 : i32
    %c0_i32_1 = arith.constant 0 : i32
    return %c0_i32, %c0_i32_0 : i32, i32
  }
  func.func @transform_4(%arg0: i32) -> (i32, i32) {
    %c0_i32 = arith.constant 0 : i32
    %c0_i32_0 = arith.constant 0 : i32
    %c0_i32_1 = arith.constant 0 : i32
    return %c0_i32, %c0_i32_0 : i32, i32
  }
  func.func @transform_5(%arg0: i32) -> (i32, i32) {
    %c0_i32 = arith.constant 0 : i32
    %c0_i32_0 = arith.constant 0 : i32
    return %c0_i32, %arg0 : i32, i32
  }
}

</mosaic_0001>

<bundles_post_ra>
// kernel: tpu_custom_call.1
= control target key start
LH: loop header
LB: loop body
LE: loop exit
PB: predicated region body
PF: predicated region fallthrough
CT: control target
= control target key end

     0   :  { %vm482_vm0 = vcmask 130048   ;;  %v3976_v4 = vmov 0   ;;  %s3970_s0 = inlined_call_operand.vmem [shape: f32[16,8], index: 0, kind: input, shape index: {}]   ;;  %s3971_s1 = inlined_call_operand.vmem [shape: bf16[384,16], index: 1, kind: input, shape index: {}]   ;;  %s3972_s2 = inlined_call_operand.vmem [shape: bf16[384,256], index: 2, kind: input, shape index: {}]   ;;  %s3973_s3 = inlined_call_operand.vmem [shape: bf16[224,128], index: 3, kind: input, shape index: {}]   ;;  %s3974_s4 = inlined_call_operand.vmem [shape: f32[384,8], index: 4, kind: input, shape index: {}]   ;;  %s3975_s5 = inlined_call_operand.hbm [shape: f32[1,8], index: 5, kind: output, shape index: {}]  }
   0x1   :  { %v71_v0 = vld [vmem:[%s3970_s0] sm:$0xff]  ;;  %v72_v1 = vld [vmem:[%s3970_s0 + $0x8] sm:$0xff]  ;;  %2688 = vset.pattern.permute.xlu0 %v3976_v4  ;;  %2689 = vset.pattern.permute.xlu1 %v3976_v4  ;;  %v2722_v6 = vld [vmem:[%s3971_s1 + $0x10] sm:$0xff]  }
   0x2   :  { %v73_v2 = vpack.c.bf16 %v72_v1, %v71_v0  ;;  %v2720_v3 = vld [vmem:[%s3971_s1] sm:$0xff]   ;;  %v2721_v5 = vld [vmem:[%s3971_s1 + $0x8] sm:$0xff]   ;;  %v2930_v7 = vld [vmem:[%s3974_s4 + $0xf0] sm:$0xff] }
   0x3   :  { %2563 = vmatprep.mubr.msk.bf16.mxu0 %vm482_vm0, %v2720_v3  ;;  %274 = vperm.xlu0 %2688, %v2930_v7   ;;  %v2936_v8 = vld [vmem:[%s3974_s4 + $0xf8] sm:$0xff]  ;;  %v2941_v9 = vld [vmem:[%s3974_s4 + $0x70] sm:$0xff]  ;;  %v2955_v11 = vld [vmem:[%s3974_s4 + $0xe0] sm:$0xff] }
   0x4   :  { %2561 = vmatprep.subr.bf16.mxu0 %v73_v2  ;;  %194 = vperm.xlu1 %2689, %v2941_v9   ;;  %v2949_v10 = vld [vmem:[%s3974_s4 + $0x78] sm:$0xff]  ;;  %v2724_v13 = vld [vmem:[%s3971_s1 + $0x20] sm:$0xff]   ;;  %v2967_v14 = vld [vmem:[%s3974_s4 + $0xe8] sm:$0xff] }
   0x5   :  { %2562 = vmatpush3.bf16.msra.mxu0 %v73_v2  ;;  %v2723_v12 = vld [vmem:[%s3971_s1 + $0x18] sm:$0xff]   ;;  %v2973_v15 = vld [vmem:[%s3974_s4 + $0x60] sm:$0xff]  ;;  %v2981_v16 = vld [vmem:[%s3974_s4 + $0x68] sm:$0xff] }
   0x6   :  { %v2987_v17 = vld [vmem:[%s3974_s4 + $0xd0] sm:$0xff]  ;;  %v2725_v18 = vld [vmem:[%s3971_s1 + $0x28] sm:$0xff]   ;;  %v2999_v20 = vld [vmem:[%s3974_s4 + $0xd8] sm:$0xff] }
   0x7   :  { %279 = vperm.xlu0 %2688, %v2936_v8   ;;  %v2726_v19 = vld [vmem:[%s3971_s1 + $0x30] sm:$0xff]   ;;  %v3013_v22 = vld [vmem:[%s3974_s4 + $0x58] sm:$0xff]  ;;  %v2728_v24 = vld [vmem:[%s3971_s1 + $0x40] sm:$0xff]  }
   0x8   :  { %2564 = vmatmul.mubr.msk.bf16.vlgmr.msra.gmra.mxu0 %vm482_vm0, %v2721_v5  ;;  %199 = vperm.xlu1 %2689, %v2949_v10   ;;  %v3005_v21 = vld [vmem:[%s3974_s4 + $0x50] sm:$0xff]  ;;  %v2727_v23 = vld [vmem:[%s3971_s1 + $0x38] sm:$0xff]   ;;  %v3025_v25 = vld [vmem:[%s3974_s4 + $0xc0] sm:$0xff] }
   0x9   :  { %2567 = vmatprep.mubr.msk.bf16.mxu0 %vm482_vm0, %v2722_v6  ;;  %v3031_v26 = vld [vmem:[%s3974_s4 + $0xc8] sm:$0xff]  ;;  %v3036_v27 = vld [vmem:[%s3974_s4 + $0x40] sm:$0xff]  ;;  %v3050_v29 = vld [vmem:[%s3974_s4 + $0xb0] sm:$0xff] }
   0xa   :  { %v3042_v28 = vld [vmem:[%s3974_s4 + $0x48] sm:$0xff]  ;;  %v2730_v31 = vld [vmem:[%s3971_s1 + $0x50] sm:$0xff]   ;;  %v3062_v32 = vld [vmem:[%s3974_s4 + $0xb8] sm:$0xff] }
   0xb   :  { %264 = vperm.xlu0 %2688, %v2955_v11   ;;  %v2729_v30 = vld [vmem:[%s3971_s1 + $0x48] sm:$0xff]   ;;  %v3068_v33 = vld [vmem:[%s3974_s4 + $0x30] sm:$0xff]  ;;  %v3074_v34 = vld [vmem:[%s3974_s4 + $0x38] sm:$0xff] }
   0xc   :  { %269 = vperm.xlu1 %2689, %v2967_v14   ;;  %v3082_v35 = vld [vmem:[%s3974_s4 + $0xa0] sm:$0xff]  ;;  %v2731_v36 = vld [vmem:[%s3971_s1 + $0x58] sm:$0xff]   ;;  %v3094_v38 = vld [vmem:[%s3974_s4 + $0xa8] sm:$0xff] }
   0xd   :  { %v2732_v37 = vld [vmem:[%s3971_s1 + $0x60] sm:$0xff]   ;;  %v3106_v40 = vld [vmem:[%s3974_s4 + $0x28] sm:$0xff]  ;;  %v3114_v41 = vld [vmem:[%s3974_s4 + $0x90] sm:$0xff] }
   0xe   :  { %v3100_v39 = vld [vmem:[%s3974_s4 + $0x20] sm:$0xff]  ;;  %v2733_v42 = vld [vmem:[%s3971_s1 + $0x68] sm:$0xff]   ;;  %v2734_v43 = vld [vmem:[%s3971_s1 + $0x70] sm:$0xff]  }
   0xf   :  { %184 = vperm.xlu0 %2688, %v2973_v15   ;;  %v3126_v44 = vld [vmem:[%s3974_s4 + $0x98] sm:$0xff]  ;;  %v3132_v45 = vld [vmem:[%s3974_s4 + $0x10] sm:$0xff]  ;;  %v3147_v47 = vld [vmem:[%s3974_s4 + $0x80] sm:$0xff] }
  0x10   :  { %2568 = vmatmul.mubr.msk.bf16.gmra.mxu0 %vm482_vm0, %v2723_v12  ;;  %189 = vperm.xlu1 %2689, %v2981_v16   ;;  %v3138_v46 = vld [vmem:[%s3974_s4 + $0x18] sm:$0xff] }
  0x11   :  { %2571 = vmatprep.mubr.msk.bf16.mxu0 %vm482_vm0, %v2724_v13 }
  0x13   :  { %254 = vperm.xlu0 %2688, %v2987_v17  }
  0x14   :  { %259 = vperm.xlu1 %2689, %v2999_v20  }
  0x17   :  { %174 = vperm.xlu0 %2688, %v3005_v21  }
  0x18   :  { %2572 = vmatmul.mubr.msk.bf16.gmra.mxu0 %vm482_vm0, %v2725_v18  ;;  %179 = vperm.xlu1 %2689, %v3013_v22  }
  0x19   :  { %2575 = vmatprep.mubr.msk.bf16.mxu0 %vm482_vm0, %v2726_v19 }
  0x1b   :  { %244 = vperm.xlu0 %2688, %v3025_v25  }
  0x1c   :  { %249 = vperm.xlu1 %2689, %v3031_v26  }
  0x1f   :  { %164 = vperm.xlu0 %2688, %v3036_v27  }
  0x20   :  { %2576 = vmatmul.mubr.msk.bf16.gmra.mxu0 %vm482_vm0, %v2727_v23  ;;  %169 = vperm.xlu1 %2689, %v3042_v28  }
  0x21   :  { %2579 = vmatprep.mubr.msk.bf16.mxu0 %vm482_vm0, %v2728_v24 }
  0x23   :  { %234 = vperm.xlu0 %2688, %v3050_v29  }
  0x24   :  { %239 = vperm.xlu1 %2689, %v3062_v32  }
  0x27   :  { %154 = vperm.xlu0 %2688, %v3068_v33  }
  0x28   :  { %2580 = vmatmul.mubr.msk.bf16.gmra.mxu0 %vm482_vm0, %v2729_v30  ;;  %159 = vperm.xlu1 %2689, %v3074_v34  }
  0x29   :  { %2583 = vmatprep.mubr.msk.bf16.mxu0 %vm482_vm0, %v2730_v31 }
  0x2b   :  { %224 = vperm.xlu0 %2688, %v3082_v35  }
  0x2c   :  { %229 = vperm.xlu1 %2689, %v3094_v38  }
  0x2f   :  { %144 = vperm.xlu0 %2688, %v3100_v39  }
  0x30   :  { %2584 = vmatmul.mubr.msk.bf16.gmra.mxu0 %vm482_vm0, %v2731_v36  ;;  %149 = vperm.xlu1 %2689, %v3106_v40  }
  0x31   :  { %2587 = vmatprep.mubr.msk.bf16.mxu0 %vm482_vm0, %v2732_v37 }
  0x33   :  { %214 = vperm.xlu0 %2688, %v3114_v41  }
  0x34   :  { %219 = vperm.xlu1 %2689, %v3126_v44  }
  0x37   :  { %134 = vperm.xlu0 %2688, %v3132_v45  }
  0x38   :  { %2588 = vmatmul.mubr.msk.bf16.gmra.mxu0 %vm482_vm0, %v2733_v42 }
  0x39   :  { %2591 = vmatprep.mubr.msk.bf16.mxu0 %vm482_vm0, %v2734_v43 }
  0x3a   :  { %10 = vsyncpa [#allocation3], 0  ;;  %v2735_v48 = vld [vmem:[%s3971_s1 + $0x78] sm:$0xff]   ;;  %139 = vperm.xlu1 %2689, %v3138_v46   ;;  %v3156_v49 = vld [vmem:[%s3974_s4 + $0x88] sm:$0xff]  ;;  %v2871_v31 = vmov 1   ;;  %vm2090_vm1 = vcmask 523264  }
  0x3b   :  { %204 = vperm.xlu0 %2688, %v3147_v47   ;;  %v3162_v50 = vld [vmem:[%s3974_s4] sm:$0xff]  ;;  %v3169_v51 = vld [vmem:[%s3974_s4 + $0x8] sm:$0xff]  ;;  %vm2170_vm2 = vcmask 64512   ;;  %vm2197_vm3 = vcmask 57344  }
  0x3c   :  { %v2738_v18 = vld [vmem:[%s3972_s2 + $0x4] ss:$8 sps:$4 sm:$0xff]  }
  0x3d   :  { %1204 = vmatprep.mubr.bf16.mxu1 %v2738_v18 }
  0x3e   :  { %209 = vperm.xlu1 %2689, %v3156_v49  }
  0x3f   :  { %124 = vperm.xlu0 %2688, %v3162_v50  }
  0x40   :  { %2592 = vmatmul.mubr.msk.bf16.gmra.mxu0 %vm482_vm0, %v2735_v48 }
  0x42   :  { %129 = vperm.xlu1 %2689, %v3169_v51  }
  0x43   :  { %2690 = vset.pattern.permute.xlu0 %v2871_v31 }
  0x44   :  { %1005 = vperm.xlu0 %2690, %v2930_v7  }
  0x46   :  { %2691 = vset.pattern.permute.xlu1 %v2871_v31 }
  0x47   :  { %1009 = vperm.xlu1 %2691, %v2936_v8  }
  0x48   :  { %945 = vperm.xlu0 %2690, %v2949_v10  }
  0x4b   :  { %941 = vperm.xlu1 %2691, %v2941_v9  }
  0x4c   :  { %1001 = vperm.xlu0 %2690, %v2967_v14  }
  0x4f   :  { %997 = vperm.xlu1 %2691, %v2955_v11  }
  0x50   :  { %937 = vperm.xlu0 %2690, %v2981_v16  }
  0x53   :  { %933 = vperm.xlu1 %2691, %v2973_v15  }
  0x54   :  { %993 = vperm.xlu0 %2690, %v2999_v20  }
  0x57   :  { %989 = vperm.xlu1 %2691, %v2987_v17  }
  0x58   :  { %929 = vperm.xlu0 %2690, %v3013_v22  }
  0x5b   :  { %925 = vperm.xlu1 %2691, %v3005_v21  }
  0x5c   :  { %985 = vperm.xlu0 %2690, %v3031_v26   ;;  %v2755_v26 = vld [vmem:[%s3971_s1 + $0x88] sm:$0xff]  }
  0x5f   :  { %981 = vperm.xlu1 %2691, %v3025_v25   ;;  %v2754_v25 = vld [vmem:[%s3971_s1 + $0x80] sm:$0xff]  }
  0x60   :  { %921 = vperm.xlu0 %2690, %v3042_v28   ;;  %2595 = vmatprep.mubr.msk.bf16.mxu0 %vm482_vm0, %v2754_v25 }
  0x61   :  { %2596 = vmatmul.mubr.msk.bf16.gmra.mxu0 %vm482_vm0, %v2755_v26 }
  0x63   :  { %917 = vperm.xlu1 %2691, %v3036_v27  }
  0x64   :  { %977 = vperm.xlu0 %2690, %v3062_v32   ;;  %v2759_v32 = vld [vmem:[%s3971_s1 + $0x90] sm:$0xff]  }
  0x65   :  { %2599 = vmatprep.mubr.msk.bf16.mxu0 %vm482_vm0, %v2759_v32 }
  0x67   :  { %973 = vperm.xlu1 %2691, %v3050_v29  }
  0x68   :  { %913 = vperm.xlu0 %2690, %v3074_v34  }
  0x6b   :  { %909 = vperm.xlu1 %2691, %v3068_v33  }
  0x6c   :  { %969 = vperm.xlu0 %2690, %v3094_v38  }
  0x6f   :  { %965 = vperm.xlu1 %2691, %v3082_v35   ;;  %v2765_v35 = vld [vmem:[%s3971_s1 + $0xa8] sm:$0xff]  }
  0x70   :  { %905 = vperm.xlu0 %2690, %v3106_v40  }
  0x73   :  { %901 = vperm.xlu1 %2691, %v3100_v39  }
  0x74   :  { %961 = vperm.xlu0 %2690, %v3126_v44  }
  0x77   :  { %957 = vperm.xlu1 %2691, %v3114_v41   ;;  %v2770_v41 = vld [vmem:[%s3971_s1 + $0xb8] sm:$0xff]  }
  0x78   :  { %897 = vperm.xlu0 %2690, %v3138_v46  }
  0x7b   :  { %893 = vperm.xlu1 %2691, %v3132_v45  }
  0x7c   :  { %953 = vperm.xlu0 %2690, %v3156_v49  }
  0x7e   :  { %v3173_v52 = vpop.permute.xlu0 %274 }
  0x7f   :  { %v3175_v53 = vpop.permute.xlu1 %194  ;;  %949 = vperm.xlu1 %2691, %v3147_v47  }
  0x80   :  { %889 = vperm.xlu0 %2690, %v3169_v51  }
  0x82   :  { %v3177_v54 = vpop.permute.xlu0 %279 }
  0x83   :  { %v3179_v55 = vpop.permute.xlu1 %199  ;;  %885 = vperm.xlu1 %2691, %v3162_v50  }
  0x86   :  { %v3181_v56 = vpop.permute.xlu0 %264 }
  0x87   :  { %v3183_v57 = vpop.permute.xlu1 %269 }
  0x8a   :  { %v3185_v58 = vpop.permute.xlu0 %184 }
  0x8b   :  { %v3187_v59 = vpop.permute.xlu1 %189 }
  0x8e   :  { %v3189_v60 = vpop.permute.xlu0 %254 }
  0x8f   :  { %v3191_v61 = vpop.permute.xlu1 %259 }
  0x92   :  { %v3193_v62 = vpop.permute.xlu0 %174 }
  0x93   :  { %v3195_v63 = vpop.permute.xlu1 %179 }
  0x96   :  { %v3197_v0 = vpop.permute.xlu0 %244 }
  0x97   :  { %v3199_v1 = vpop.permute.xlu1 %249 }
  0x9a   :  { %v3201_v2 = vpop.permute.xlu0 %164 }
  0x9b   :  { %v3203_v3 = vpop.permute.xlu1 %169 }
  0x9e   :  { %v3205_v5 = vpop.permute.xlu0 %234 }
  0x9f   :  { %v3207_v6 = vpop.permute.xlu1 %239 }
  0xa2   :  { %v155_v12 = vpop.permute.xlu0 %154 }
  0xa3   :  { %v160_v13 = vpop.permute.xlu1 %159 }
  0xa6   :  { %v3212_v19 = vpop.permute.xlu0 %224 }
  0xa7   :  { %v3214_v23 = vpop.permute.xlu1 %229 }
  0xaa   :  { %v145_v24 = vpop.permute.xlu0 %144 }
  0xab   :  { %v150_v30 = vpop.permute.xlu1 %149 }
  0xae   :  { %v3218_v36 = vpop.permute.xlu0 %214 }
  0xaf   :  { %v3222_v37 = vpop.permute.xlu1 %219 }
  0xb2   :  { %v135_v42 = vpop.permute.xlu0 %134 }
  0xb5   :  { %v140_v43 = vpop.permute.xlu1 %139 }
  0xb6   :  { %v3228_v8 = vpop.permute.xlu0 %204 }
  0xb7   :  { %3988 = vst [vmem:[#allocation5_spill] sm:$0xff] %v3228_v8 }
  0xb9   :  { %v3232_v7 = vpop.permute.xlu1 %209 }
  0xba   :  { %3989 = vst [vmem:[#allocation6_spill] sm:$0xff] %v3232_v7  ;;  %v125_v11 = vpop.permute.xlu0 %124 }
  0xbd   :  { %v130_v15 = vpop.permute.xlu1 %129 }
  0xc8   :  { %v2565_v9 = vpop.f32.mrf.mxu0 }
  0xc9   :  { %v598_v14 = vadd.f32 %v2565_v9, %v135_v42 }
  0xca   :  { %v589_v10 = vpop.f32.mrf.mxu0 }
  0xcb   :  { %v590_v18 = vadd.f32 %v589_v10, %v125_v11  ;;  %v782_v20 = vmax.f32 %v598_v14, 0.0 }
  0xcc   :  { %v2566_v48 = vpop.f32.mrf.mxu0 }
  0xcd   :  { %v601_v16 = vadd.f32 %v2566_v48, %v140_v43  ;;  %v780_v7 = vmax.f32 %v590_v18, 0.0 }
  0xce   :  { %v592_v17 = vpop.f32.mrf.mxu0 }
  0xcf   :  { %v783_v31 = vmax.f32 %v601_v16, 0.0  ;;  %v593_v4 = vadd.f32 %v592_v17, %v130_v15  ;;  %v2764_v16 = vld [vmem:[%s3971_s1 + $0xa0] sm:$0xff]  }
  0xd0   :  { %v2569_v8 = vpop.f32.mrf.mxu0 }
  0xd1   :  { %v3238_v21 = vpack.c.bf16 %v783_v31, %v782_v20  ;;  %v781_v22 = vmax.f32 %v593_v4, 0.0  ;;  %v614_v9 = vadd.f32 %v2569_v8, %v155_v12  ;;  %v2769_v20 = vld [vmem:[%s3971_s1 + $0xb0] sm:$0xff]  }
  0xd2   :  { %v605_v42 = vpop.f32.mrf.mxu0 }
  0xd3   :  { %v3242_v43 = vpack.c.bf16 %v781_v22, %v780_v7  ;;  %v606_v11 = vadd.f32 %v605_v42, %v145_v24  ;;  %v786_v27 = vmax.f32 %v614_v9, 0.0  ;;  %v2760_v24 = vld [vmem:[%s3971_s1 + $0x98] sm:$0xff]   ;;  %v3990_v42 = vmov 0  }
  0xd4   :  { %v2570_v10 = vpop.f32.mrf.mxu0  ;;  %2600 = vmatmul.mubr.msk.bf16.gmra.mxu0 %vm482_vm0, %v2760_v24  ;;  %2692 = vset.pattern.permute.xlu1 %v3990_v42 }
  0xd5   :  { %v617_v14 = vadd.f32 %v2570_v10, %v160_v13  ;;  %v784_v7 = vmax.f32 %v606_v11, 0.0  ;;  %2603 = vmatprep.mubr.msk.bf16.mxu0 %vm482_vm0, %v2764_v16  ;;  %2693 = vset.pattern.permute.xlu0 %v3990_v42 }
  0xd6   :  { %v608_v4 = vpop.f32.mrf.mxu0 }
  0xd7   :  { %v787_v28 = vmax.f32 %v617_v14, 0.0  ;;  %v609_v12 = vadd.f32 %v608_v4, %v150_v30 }
  0xd8   :  { %v3254_v8 = vpop.f32.mrf.mxu0 }
  0xd9   :  { %v3256_v48 = vpack.c.bf16 %v787_v28, %v786_v27  ;;  %v785_v15 = vmax.f32 %v609_v12, 0.0 }
  0xda   :  { %v3259_v13 = vpop.f32.mrf.mxu0 }
  0xdb   :  { %v3262_v29 = vpack.c.bf16 %v785_v15, %v784_v7 }
  0xdc   :  { %v3270_v30 = vpop.f32.mrf.mxu0  ;;  %2604 = vmatmul.mubr.msk.bf16.gmra.mxu0 %vm482_vm0, %v2765_v35 }
  0xdd   :  { %2607 = vmatprep.mubr.msk.bf16.mxu0 %vm482_vm0, %v2769_v20 }
  0xde   :  { %v3274_v33 = vpop.f32.mrf.mxu0 }
  0xe0   :  { %v2577_v34 = vpop.f32.mrf.mxu0 }
  0xe1   :  { %v646_v4 = vadd.f32 %v2577_v34, %v3175_v53 }
  0xe2   :  { %v637_v18 = vpop.f32.mrf.mxu0 }
  0xe3   :  { %v794_v35 = vmax.f32 %v646_v4, 0.0 }
  0xe4   :  { %v2578_v17 = vpop.f32.mrf.mxu0  ;;  %2608 = vmatmul.mubr.msk.bf16.gmra.mxu0 %vm482_vm0, %v2770_v41 }
  0xe5   :  { %v649_v49 = vadd.f32 %v2578_v17, %v3179_v55 }
  0xe6   :  { %v640_v38 = vpop.f32.mrf.mxu0 }
  0xe7   :  { %v795_v12 = vmax.f32 %v649_v49, 0.0  ;;  %v641_v7 = vadd.f32 %v640_v38, %v3187_v59 }
  0xe8   :  { %v3290_v39 = vpop.f32.mrf.mxu0 }
  0xe9   :  { %v793_v20 = vmax.f32 %v641_v7, 0.0  ;;  %v835_v59 = vpack.c.bf16 %v795_v12, %v794_v35  ;;  %v67_v7 = vld [vmem:[%s3974_s4 + $0x168] sm:$0xff]  ;;  %v58_v35 = vld [vmem:[%s3974_s4 + $0x120] sm:$0xff] }
  0xea   :  { %v3293_v40 = vpop.f32.mrf.mxu0 }
  0xec   :  { %v3302_v31 = vpop.f32.mrf.mxu0 }
  0xee   :  { %v3306_v44 = vpop.f32.mrf.mxu0 }
  0xf0   :  { %v2585_v45 = vpop.f32.mrf.mxu0 }
  0xf2   :  { %v3311_v46 = vpop.f32.mrf.mxu0 }
  0xf4   :  { %v2586_v22 = vpop.f32.mrf.mxu0 }
  0xf6   :  { %v672_v9 = vpop.f32.mrf.mxu0 }
  0xf8   :  { %v2589_v47 = vpop.f32.mrf.mxu0 }
  0xf9   :  { %v694_v53 = vadd.f32 %v2589_v47, %v3189_v60  ;;  %v681_v47 = vadd.f32 %v2586_v22, %v3207_v6  ;;  %v670_v22 = vadd.f32 %v3311_v46, %v3212_v19  ;;  %v3992_v46 = vld [vmem:[#allocation5_spill] sm:$0xff] }
  0xfa   :  { %v685_v25 = vpop.f32.mrf.mxu0 }
  0xfb   :  { %v686_v60 = vadd.f32 %v685_v25, %v3197_v0  ;;  %v803_v49 = vmax.f32 %v681_v47, 0.0  ;;  %v800_v4 = vmax.f32 %v670_v22, 0.0 }
  0xfc   :  { %v2590_v26 = vpop.f32.mrf.mxu0 }
  0xfd   :  { %v697_v32 = vadd.f32 %v2590_v26, %v3191_v61 }
  0xfe   :  { %v688_v10 = vpop.f32.mrf.mxu0 }
  0xff   :  { %v807_v38 = vmax.f32 %v697_v32, 0.0  ;;  %v689_v61 = vadd.f32 %v688_v10, %v3199_v1  ;;  %v60_v32 = vld [vmem:[%s3974_s4 + $0x130] sm:$0xff] }
 0x100   :  { %v2593_v11 = vpop.f32.mrf.mxu0 }
 0x101   :  { %v710_v50 = vadd.f32 %v2593_v11, %v3173_v52  ;;  %v638_v52 = vadd.f32 %v637_v18, %v3185_v58  ;;  %v806_v58 = vmax.f32 %v694_v53, 0.0  ;;  %v805_v1 = vmax.f32 %v689_v61, 0.0  ;;  %v56_v53 = vld [vmem:[%s3974_s4 + $0x110] sm:$0xff]  ;;  %v55_v61 = vld [vmem:[%s3974_s4 + $0x108] sm:$0xff] }
 0x102   :  { %v701_v14 = vpop.f32.mrf.mxu0  ;;  %v622_v11 = vadd.f32 %v3259_v13, %v3201_v2  ;;  %v665_v2 = vadd.f32 %v3302_v31, %v3222_v37 }
 0x103   :  { %v702_v51 = vadd.f32 %v701_v14, %v3181_v56  ;;  %v810_v24 = vmax.f32 %v710_v50, 0.0  ;;  %v792_v42 = vmax.f32 %v638_v52, 0.0  ;;  %v841_v26 = vpack.c.bf16 %v807_v38, %v806_v58  ;;  %v61_v52 = vld [vmem:[%s3974_s4 + $0x138] sm:$0xff]  ;;  %v2748_v38 = vld [vmem:[%s3972_s2 + $0x44] ss:$8 sps:$4 sm:$0xff]  }
 0x104   :  { %v2594_v27 = vpop.f32.mrf.mxu0  ;;  %v673_v14 = vadd.f32 %v672_v9, %v3214_v23  ;;  %v799_v23 = vmax.f32 %v665_v2, 0.0  ;;  %v3991_v9 = vld [vmem:[#allocation6_spill] sm:$0xff]  ;;  %v2777_v2 = vld [vmem:[%s3972_s2 + $0xb4] ss:$8 sps:$4 sm:$0xff]  }
 0x105   :  { %v713_v28 = vadd.f32 %v2594_v27, %v3177_v54  ;;  %v808_v34 = vmax.f32 %v702_v51, 0.0  ;;  %v633_v54 = vadd.f32 %v3270_v30, %v3195_v63  ;;  %v625_v63 = vadd.f32 %v3274_v33, %v3203_v3  ;;  %v2756_v58 = vld [vmem:[%s3972_s2 + $0x64] ss:$8 sps:$4 sm:$0xff]  }
 0x106   :  { %v704_v15 = vpop.f32.mrf.mxu0  ;;  %v834_v30 = vpack.c.bf16 %v793_v20, %v792_v42  ;;  %v788_v33 = vmax.f32 %v622_v11, 0.0  ;;  %v801_v13 = vmax.f32 %v673_v14, 0.0  ;;  %v657_v27 = vadd.f32 %v3306_v44, %v3991_v9  ;;  %v2736_v44 = vld [vmem:[%s3972_s2] ss:$8 sps:$4 sm:$0xff]   ;;  %v57_v20 = vld [vmem:[%s3974_s4 + $0x118] sm:$0xff] }
 0x107   :  { %v811_v16 = vmax.f32 %v713_v28, 0.0  ;;  %v705_v55 = vadd.f32 %v704_v15, %v3183_v57  ;;  %v630_v57 = vadd.f32 %v3254_v8, %v3193_v62  ;;  %v791_v18 = vmax.f32 %v633_v54, 0.0  ;;  %v62_v15 = vld [vmem:[%s3974_s4 + $0x140] sm:$0xff]  ;;  %v2753_v42 = vld [vmem:[%s3972_s2 + $0x50] ss:$8 sps:$4 sm:$0xff]  }
 0x108   :  { %v678_v62 = vadd.f32 %v2585_v45, %v3205_v5  ;;  %v804_v8 = vmax.f32 %v686_v60, 0.0  ;;  %v789_v25 = vmax.f32 %v625_v63, 0.0  ;;  %v662_v45 = vadd.f32 %v3290_v39, %v3218_v36  ;;  %v68_v39 = vld [vmem:[%s3974_s4 + $0x170] sm:$0xff]  ;;  %v54_v54 = vld [vmem:[%s3974_s4 + $0x100] sm:$0xff]  ;;  %v3443_v63 = vpop.permute.xlu1 %1009 }
 0x109   :  { %v809_v17 = vmax.f32 %v705_v55, 0.0  ;;  %v843_v56 = vpack.c.bf16 %v811_v16, %v810_v24  ;;  %v790_v10 = vmax.f32 %v630_v57, 0.0  ;;  %v838_v51 = vpack.c.bf16 %v801_v13, %v800_v4  ;;  %354 = vperm.xlu1 %2692, %v68_v39   ;;  %v2741_v24 = vld [vmem:[%s3972_s2 + $0x10] ss:$8 sps:$4 sm:$0xff]   ;;  %v2742_v16 = vld [vmem:[%s3972_s2 + $0x24] ss:$8 sps:$4 sm:$0xff]  }
 0x10a   :  { %v840_v3 = vpack.c.bf16 %v805_v1, %v804_v8  ;;  %v802_v6 = vmax.f32 %v678_v62, 0.0  ;;  %v832_v50 = vpack.c.bf16 %v789_v25, %v788_v33  ;;  %v798_v19 = vmax.f32 %v662_v45, 0.0  ;;  %v63_v55 = vld [vmem:[%s3974_s4 + $0x148] sm:$0xff]  ;;  %v2751_v57 = vld [vmem:[%s3972_s2 + $0x54] ss:$8 sps:$4 sm:$0xff]  }
 0x10b   :  { %v842_v41 = vpack.c.bf16 %v809_v17, %v808_v34  ;;  %2351 = vmatprep.subr.bf16.mxu1 %v843_v56  ;;  %v833_v0 = vpack.c.bf16 %v791_v18, %v790_v10  ;;  %v654_v28 = vadd.f32 %v3293_v40, %v3992_v46  ;;  %v797_v31 = vmax.f32 %v657_v27, 0.0  ;;  %v66_v40 = vld [vmem:[%s3974_s4 + $0x160] sm:$0xff]  ;;  %v2745_v17 = vld [vmem:[%s3972_s2 + $0x34] ss:$8 sps:$4 sm:$0xff]   ;;  %v59_v56 = vld [vmem:[%s3974_s4 + $0x128] sm:$0xff] }
 0x10c   :  { %2352 = vmatpush3.bf16.msra.mxu1 %v835_v59  ;;  %v839_v5 = vpack.c.bf16 %v803_v49, %v802_v6  ;;  %v837_v37 = vpack.c.bf16 %v799_v23, %v798_v19  ;;  %v2744_v34 = vld [vmem:[%s3972_s2 + $0x20] ss:$8 sps:$4 sm:$0xff]   ;;  %v2747_v59 = vld [vmem:[%s3972_s2 + $0x30] ss:$8 sps:$4 sm:$0xff]   ;;  %v2761_v18 = vld [vmem:[%s3972_s2 + $0x74] ss:$8 sps:$4 sm:$0xff]   ;;  %v3447_v47 = vpop.permute.xlu1 %941 }
 0x10d   :  { %2353 = vmatprep.subr.bf16.mxu1 %v842_v41  ;;  %v796_v12 = vmax.f32 %v654_v28, 0.0  ;;  %344 = vperm.xlu1 %2692, %v66_v40   ;;  %v2750_v41 = vld [vmem:[%s3972_s2 + $0x40] ss:$8 sps:$4 sm:$0xff]   ;;  %v2766_v1 = vld [vmem:[%s3972_s2 + $0x84] ss:$8 sps:$4 sm:$0xff]  }
 0x10e   :  { %v2758_v60 = vld [vmem:[%s3972_s2 + $0x60] ss:$8 sps:$4 sm:$0xff]   ;;  %v2771_v8 = vld [vmem:[%s3972_s2 + $0x94] ss:$8 sps:$4 sm:$0xff]   ;;  %v2773_v49 = vld [vmem:[%s3972_s2 + $0x90] ss:$8 sps:$4 sm:$0xff]  }
 0x10f   :  { %v836_v36 = vpack.c.bf16 %v797_v31, %v796_v12  ;;  %v2768_v62 = vld [vmem:[%s3972_s2 + $0x80] ss:$8 sps:$4 sm:$0xff]   ;;  %v2779_v45 = vld [vmem:[%s3972_s2 + $0xb0] ss:$8 sps:$4 sm:$0xff]   ;;  %v2780_v4 = vld [vmem:[%s3972_s2 + $0xc4] ss:$8 sps:$4 sm:$0xff]  }
 0x110   :  { %2354 = vmatpush3.bf16.msra.mxu1 %v834_v30  ;;  %v3445_v30 = vpop.permute.xlu0 %1005  ;;  %v3457_v11 = vpop.permute.xlu1 %997  ;;  %v2782_v27 = vld [vmem:[%s3972_s2 + $0xc0] ss:$8 sps:$4 sm:$0xff]   ;;  %v2783_v19 = vld [vmem:[%s3972_s2 + $0xd4] ss:$8 sps:$4 sm:$0xff]   ;;  %v2785_v31 = vld [vmem:[%s3972_s2 + $0xd0] ss:$8 sps:$4 sm:$0xff]  }
 0x111   :  { %2355 = vmatprep.subr.bf16.mxu1 %v841_v26  ;;  %349 = vperm.xlu1 %2692, %v67_v7   ;;  %v2763_v26 = vld [vmem:[%s3972_s2 + $0x70] ss:$8 sps:$4 sm:$0xff]   ;;  %v2786_v12 = vld [vmem:[%s3972_s2 + $0xe4] ss:$8 sps:$4 sm:$0xff]   ;;  %v2789_v40 = vld [vmem:[%s3972_s2 + $0xf4] ss:$8 sps:$4 sm:$0xff]  }
 0x114   :  { %2356 = vmatpush3.bf16.msra.mxu1 %v833_v0  ;;  %v3455_v10 = vpop.permute.xlu0 %945  ;;  %v3467_v25 = vpop.permute.xlu1 %933 }
 0x115   :  { %2357 = vmatprep.subr.bf16.mxu1 %v840_v3  ;;  %v2774_v3 = vld [vmem:[%s3972_s2 + $0xa4] ss:$8 sps:$4 sm:$0xff]  }
 0x118   :  { %2358 = vmatpush3.bf16.msra.mxu1 %v832_v50  ;;  %v3465_v0 = vpop.permute.xlu0 %1001  ;;  %v3477_v33 = vpop.permute.xlu1 %989  ;;  %v2776_v50 = vld [vmem:[%s3972_s2 + $0xa0] ss:$8 sps:$4 sm:$0xff]  }
 0x119   :  { %2359 = vmatprep.subr.bf16.mxu1 %v839_v5 }
 0x11c   :  { %2360 = vmatpush3.bf16.msra.mxu1 %v3256_v48  ;;  %v69_v48 = vld [vmem:[%s3974_s4 + $0x178] sm:$0xff]  ;;  %v3472_v14 = vpop.permute.xlu0 %937  ;;  %v3481_v22 = vpop.permute.xlu1 %925 }
 0x11d   :  { %2361 = vmatprep.subr.bf16.mxu1 %v838_v51  ;;  %359 = vperm.xlu0 %2693, %v69_v48   ;;  %v2788_v48 = vld [vmem:[%s3972_s2 + $0xe0] ss:$8 sps:$4 sm:$0xff]  }
 0x120   :  { %2362 = vmatpush3.bf16.msra.mxu1 %v3262_v29  ;;  %v64_v29 = vld [vmem:[%s3974_s4 + $0x150] sm:$0xff]  ;;  %v3479_v6 = vpop.permute.xlu0 %993  ;;  %v3491_v13 = vpop.permute.xlu1 %981 }
 0x121   :  { %2363 = vmatprep.subr.bf16.mxu1 %v837_v37  ;;  %334 = vperm.xlu0 %2693, %v64_v29  }
 0x124   :  { %2364 = vmatpush3.bf16.msra.mxu1 %v3238_v21  ;;  %v2739_v21 = vld [vmem:[%s3972_s2 + $0x14] ss:$8 sps:$4 sm:$0xff]   ;;  %v3489_v5 = vpop.permute.xlu0 %929  ;;  %v3501_v9 = vpop.permute.xlu1 %917 }
 0x125   :  { %2365 = vmatprep.subr.bf16.mxu1 %v836_v36  ;;  %324 = vperm.xlu0 %2693, %v62_v15  }
 0x128   :  { %2366 = vmatpush3.bf16.msra.mxu1 %v3242_v43  ;;  %v65_v43 = vld [vmem:[%s3974_s4 + $0x158] sm:$0xff]  ;;  %v3499_v23 = vpop.permute.xlu0 %985  ;;  %v3511_v46 = vpop.permute.xlu1 %973 }
 0x129   :  { %339 = vperm.xlu1 %2692, %v65_v43   ;;  %314 = vperm.xlu0 %2693, %v60_v32   ;;  %v3544_v43 = vpop.f32.mrf.mxu0 }
 0x12b   :  { %1205 = vmatmul.mubr.bf16.vlgmr.msra.gmra.mxu1 %v2736_v44  ;;  %v3546_v32 = vpop.f32.mrf.mxu0 }
 0x12c   :  { %1212 = vmatprep.mubr.bf16.mxu1 %v2739_v21  ;;  %v3506_v51 = vpop.permute.xlu0 %921  ;;  %v3515_v37 = vpop.permute.xlu1 %909  ;;  %v2791_v21 = vld [vmem:[%s3972_s2 + $0xf0] ss:$8 sps:$4 sm:$0xff]  }
 0x12d   :  { %329 = vperm.xlu1 %2692, %v63_v55   ;;  %304 = vperm.xlu0 %2693, %v58_v35  }
 0x130   :  { %v3513_v28 = vpop.permute.xlu0 %977  ;;  %v3525_v39 = vpop.permute.xlu1 %965 }
 0x131   :  { %319 = vperm.xlu1 %2692, %v61_v52   ;;  %294 = vperm.xlu0 %2693, %v56_v53   ;;  %3993 = vst [vmem:[#allocation6_spill] sm:$0xff] %v3525_v39 }
 0x133   :  { %1213 = vmatmul.mubr.bf16.gmra.mxu1 %v2741_v24  ;;  %v3548_v24 = vpop.f32.mrf.mxu0 }
 0x134   :  { %1220 = vmatprep.mubr.bf16.mxu1 %v2742_v16  ;;  %v3523_v36 = vpop.permute.xlu0 %913  ;;  %v3535_v44 = vpop.permute.xlu1 %901 }
 0x135   :  { %309 = vperm.xlu1 %2692, %v59_v56   ;;  %284 = vperm.xlu0 %2693, %v54_v54   ;;  %v3554_v35 = vpop.f32.mrf.mxu0 }
 0x138   :  { %v3533_v29 = vpop.permute.xlu0 %969  ;;  %v3542_v15 = vpop.permute.xlu1 %957 }
 0x139   :  { %299 = vperm.xlu1 %2692, %v57_v20   ;;  %3994 = vst [vmem:[#allocation5_spill] sm:$0xff] %v3533_v29 }
 0x13b   :  { %1221 = vmatmul.mubr.bf16.gmra.mxu1 %v2744_v34 }
 0x13c   :  { %1228 = vmatprep.mubr.bf16.mxu1 %v2745_v17  ;;  %v3540_v7 = vpop.permute.xlu0 %905  ;;  %v3552_v55 = vpop.permute.xlu1 %893 }
 0x13d   :  { %289 = vperm.xlu1 %2692, %v55_v61  }
 0x140   :  { %v3550_v16 = vpop.permute.xlu0 %961  ;;  %v3558_v17 = vpop.permute.xlu1 %949 }
 0x143   :  { %1229 = vmatmul.mubr.bf16.gmra.mxu1 %v2747_v59 }
 0x144   :  { %1236 = vmatprep.mubr.bf16.mxu1 %v2748_v38  ;;  %v3556_v34 = vpop.permute.xlu0 %897  ;;  %v3562_v38 = vpop.permute.xlu1 %885 }
 0x148   :  { %v3560_v59 = vpop.permute.xlu0 %953 }
 0x14b   :  { %1237 = vmatmul.mubr.bf16.gmra.mxu1 %v2750_v41 }
 0x14c   :  { %1244 = vmatprep.mubr.bf16.mxu1 %v2751_v57 }
 0x153   :  { %1245 = vmatmul.mubr.bf16.gmra.mxu1 %v2753_v42 }
 0x154   :  { %1252 = vmatprep.mubr.bf16.mxu1 %v2756_v58  ;;  %v3564_v58 = vpop.permute.xlu0 %889 }
 0x15b   :  { %1253 = vmatmul.mubr.bf16.gmra.mxu1 %v2758_v60 }
 0x15c   :  { %1260 = vmatprep.mubr.bf16.mxu1 %v2761_v18 }
 0x163   :  { %1261 = vmatmul.mubr.bf16.gmra.mxu1 %v2763_v26 }
 0x164   :  { %1268 = vmatprep.mubr.bf16.mxu1 %v2766_v1 }
 0x16b   :  { %1269 = vmatmul.mubr.bf16.gmra.mxu1 %v2768_v62 }
 0x16c   :  { %1276 = vmatprep.mubr.bf16.mxu1 %v2771_v8 }
 0x173   :  { %1277 = vmatmul.mubr.bf16.gmra.mxu1 %v2773_v49 }
 0x174   :  { %1284 = vmatprep.mubr.bf16.mxu1 %v2774_v3 }
 0x17b   :  { %1285 = vmatmul.mubr.bf16.gmra.mxu1 %v2776_v50 }
 0x17c   :  { %1292 = vmatprep.mubr.bf16.mxu1 %v2777_v2 }
 0x183   :  { %1293 = vmatmul.mubr.bf16.gmra.mxu1 %v2779_v45 }
 0x184   :  { %1300 = vmatprep.mubr.bf16.mxu1 %v2780_v4  ;;  %v355_v42 = vpop.permute.xlu1 %354 }
 0x188   :  { %v345_v1 = vpop.permute.xlu1 %344 }
 0x18b   :  { %1301 = vmatmul.mubr.bf16.gmra.mxu1 %v2782_v27 }
 0x18c   :  { %1308 = vmatprep.mubr.bf16.mxu1 %v2783_v19  ;;  %v350_v45 = vpop.permute.xlu1 %349 }
 0x193   :  { %1309 = vmatmul.mubr.bf16.gmra.mxu1 %v2785_v31 }
 0x194   :  { %1316 = vmatprep.mubr.bf16.mxu1 %v2786_v12  ;;  %v2601_v52 = vpop.f32.mrf.mxu0 }
 0x196   :  { %v733_v53 = vpop.f32.mrf.mxu0 }
 0x198   :  { %v2602_v56 = vpop.f32.mrf.mxu0  ;;  %v360_v8 = vpop.permute.xlu0 %359 }
 0x19a   :  { %v736_v54 = vpop.f32.mrf.mxu0 }
 0x19b   :  { %1317 = vmatmul.mubr.bf16.gmra.mxu1 %v2788_v48 }
 0x19c   :  { %1324 = vmatprep.mubr.bf16.mxu1 %v2789_v40  ;;  %v2605_v20 = vpop.f32.mrf.mxu0  ;;  %v335_v40 = vpop.permute.xlu0 %334 }
 0x19e   :  { %v749_v61 = vpop.f32.mrf.mxu0 }
 0x1a0   :  { %v2606_v41 = vpop.f32.mrf.mxu0 }
 0x1a2   :  { %v752_v57 = vpop.f32.mrf.mxu0 }
 0x1a3   :  { %1325 = vmatmul.mubr.bf16.gmra.mxu1 %v2791_v21 }
 0x1a4   :  { %v2609_v60 = vpop.f32.mrf.mxu0  ;;  %v340_v48 = vpop.permute.xlu1 %339 }
 0x1a5   :  { %v774_v18 = vadd.f32 %v2609_v60, %v355_v42  ;;  %v761_v39 = vadd.f32 %v2606_v41, %v340_v48  ;;  %v758_v42 = vadd.f32 %v2605_v20, %v335_v40 }
 0x1a6   :  { %v765_v26 = vpop.f32.mrf.mxu0 }
 0x1a7   :  { %v766_v62 = vadd.f32 %v765_v26, %v345_v1  ;;  %v826_v3 = vmax.f32 %v774_v18, 0.0  ;;  %v823_v60 = vmax.f32 %v761_v39, 0.0  ;;  %v822_v26 = vmax.f32 %v758_v42, 0.0  ;;  %v325_v18 = vpop.permute.xlu0 %324 }
 0x1a8   :  { %v2610_v49 = vpop.f32.mrf.mxu0  ;;  %v330_v1 = vpop.permute.xlu1 %329  ;;  %v750_v29 = vadd.f32 %v749_v61, %v325_v18 }
 0x1a9   :  { %v777_v50 = vadd.f32 %v2610_v49, %v360_v8  ;;  %v824_v4 = vmax.f32 %v766_v62, 0.0  ;;  %v849_v8 = vpack.c.bf16 %v823_v60, %v822_v26  ;;  %v753_v49 = vadd.f32 %v752_v57, %v330_v1 }
 0x1aa   :  { %v768_v2 = vpop.f32.mrf.mxu0 }
 0x1ab   :  { %v827_v27 = vmax.f32 %v777_v50, 0.0  ;;  %v769_v19 = vadd.f32 %v768_v2, %v350_v45  ;;  %v821_v62 = vmax.f32 %v753_v49, 0.0  ;;  %v820_v50 = vmax.f32 %v750_v29, 0.0  ;;  %v315_v2 = vpop.permute.xlu0 %314 }
 0x1ad   :  { %v851_v31 = vpack.c.bf16 %v827_v27, %v826_v3  ;;  %v825_v12 = vmax.f32 %v769_v19, 0.0  ;;  %v320_v3 = vpop.permute.xlu1 %319  ;;  %v848_v45 = vpack.c.bf16 %v821_v62, %v820_v50  ;;  %v742_v27 = vadd.f32 %v2601_v52, %v315_v2 }
 0x1af   :  { %v850_v21 = vpack.c.bf16 %v825_v12, %v824_v4  ;;  %2611 = vmatprep.subr.bf16.mxu1 %v851_v31  ;;  %v745_v4 = vadd.f32 %v2602_v56, %v320_v3  ;;  %v818_v41 = vmax.f32 %v742_v27, 0.0  ;;  %v305_v19 = vpop.permute.xlu0 %304 }
 0x1b0   :  { %2612 = vmatpush3.bf16.msra.mxu1 %v851_v31  ;;  %v734_v48 = vadd.f32 %v733_v53, %v305_v19 }
 0x1b1   :  { %2613 = vmatprep.subr.bf16.mxu1 %v850_v21  ;;  %v819_v20 = vmax.f32 %v745_v4, 0.0  ;;  %v310_v39 = vpop.permute.xlu1 %309 }
 0x1b2   :  { %v737_v12 = vadd.f32 %v736_v54, %v310_v39  ;;  %v816_v57 = vmax.f32 %v734_v48, 0.0 }
 0x1b3   :  { %v847_v31 = vpack.c.bf16 %v819_v20, %v818_v41  ;;  %v295_v40 = vpop.permute.xlu0 %294 }
 0x1b4   :  { %2614 = vmatpush3.bf16.msra.mxu1 %v850_v21  ;;  %v817_v61 = vmax.f32 %v737_v12, 0.0  ;;  %v726_v52 = vadd.f32 %v3544_v43, %v295_v40  ;;  %v2804_v40 = vld [vmem:[%s3973_s3] sm:$0xff]  }
 0x1b5   :  { %2615 = vmatprep.subr.bf16.mxu1 %v849_v8  ;;  %v300_v29 = vpop.permute.xlu1 %299  ;;  %2627 = vmatprep.mubr.bf16.mxu1 %v2804_v40 }
 0x1b6   :  { %v846_v21 = vpack.c.bf16 %v817_v61, %v816_v57  ;;  %v729_v42 = vadd.f32 %v3548_v24, %v300_v29  ;;  %v814_v60 = vmax.f32 %v726_v52, 0.0  ;;  %v2805_v52 = vld [vmem:[%s3973_s3 + $0x8] sm:$0xff]  }
 0x1b7   :  { %v285_v1 = vpop.permute.xlu0 %284 }
 0x1b8   :  { %2616 = vmatpush3.bf16.msra.mxu1 %v849_v8  ;;  %v815_v56 = vmax.f32 %v729_v42, 0.0  ;;  %v718_v54 = vadd.f32 %v3546_v32, %v285_v1 }
 0x1b9   :  { %2617 = vmatprep.subr.bf16.mxu1 %v848_v45  ;;  %v290_v26 = vpop.permute.xlu1 %289 }
 0x1ba   :  { %v845_v18 = vpack.c.bf16 %v815_v56, %v814_v60  ;;  %v721_v53 = vadd.f32 %v3554_v35, %v290_v26  ;;  %v812_v49 = vmax.f32 %v718_v54, 0.0  ;;  %v2832_v54 = vld [vmem:[%s3974_s4 + $0x78] sm:$0xff] }
 0x1bc   :  { %2618 = vmatpush3.bf16.msra.mxu1 %v848_v45  ;;  %v813_v8 = vmax.f32 %v721_v53, 0.0 }
 0x1bd   :  { %2619 = vmatprep.subr.bf16.mxu1 %v847_v31 }
 0x1be   :  { %v844_v62 = vpack.c.bf16 %v813_v8, %v812_v49  ;;  %v2833_v8 = vld [vmem:[%s3974_s4 + $0x70] sm:$0xff] }
 0x1bf   :  { %v2812_v49 = vld [vmem:[%s3973_s3 + $0x10] sm:$0xff]  }
 0x1c0   :  { %2620 = vmatpush3.bf16.msra.mxu1 %v847_v31 }
 0x1c1   :  { %2621 = vmatprep.subr.bf16.mxu1 %v846_v21 }
 0x1c4   :  { %2622 = vmatpush3.bf16.msra.mxu1 %v846_v21 }
 0x1c5   :  { %2623 = vmatprep.subr.bf16.mxu1 %v845_v18 }
 0x1c8   :  { %2624 = vmatpush3.bf16.msra.mxu1 %v845_v18  ;;  %v2872_v18 = vmov 2  }
 0x1c9   :  { %2625 = vmatprep.subr.bf16.mxu1 %v844_v62  ;;  %2695 = vset.pattern.permute.xlu1 %v2872_v18 }
 0x1ca   :  { %2694 = vset.pattern.permute.xlu0 %v2872_v18  ;;  %1458 = vperm.xlu1 %2695, %v2832_v54  }
 0x1cb   :  { %1454 = vperm.xlu0 %2694, %v2833_v8  }
 0x1cc   :  { %2626 = vmatpush3.bf16.msra.mxu1 %v844_v62 }
 0x1cf   :  { %2628 = vmatmul.mubr.bf16.vlgmr.msra.gmra.mxu1 %v2805_v52  ;;  %v2838_v52 = vld [vmem:[%s3974_s4 + $0x68] sm:$0xff] }
 0x1d0   :  { %2631 = vmatprep.mubr.bf16.mxu1 %v2812_v49 }
 0x1eb   :  { %v2367_v43 = vpop.f32.mrf.mxu1 }
 0x1ed   :  { %v2368_v24 = vpop.f32.mrf.mxu1 }
 0x1ee   :  { %v2369_v50 = vadd.f32 %v2368_v24, %v2367_v43 }
 0x1ef   :  { %v2370_v3 = vpop.f32.mrf.mxu1 }
 0x1f0   :  { %v1207_v2 = vadd.f32 %v2369_v50, %v3562_v38 }
 0x1f1   :  { %v2371_v45 = vpop.f32.mrf.mxu1 }
 0x1f2   :  { %v2372_v4 = vadd.f32 %v2371_v45, %v2370_v3  ;;  %v1333_v20 = vmax.f32 %v1207_v2, 0.0  ;;  %v2873_v2 = vmov 3  }
 0x1f3   :  { %v2373_v27 = vpop.f32.mrf.mxu1  ;;  %2696 = vset.pattern.permute.xlu1 %v2873_v2 }
 0x1f4   :  { %v1210_v35 = vadd.f32 %v2372_v4, %v3564_v58  ;;  %1727 = vperm.xlu1 %2696, %v2833_v8   ;;  %v3606_v4 = vld [vmem:[%s3974_s4 + $0x50] sm:$0xff] }
 0x1f5   :  { %v2374_v32 = vpop.f32.mrf.mxu1  ;;  %1438 = vperm.xlu0 %2694, %v3606_v4  }
 0x1f6   :  { %v1334_v41 = vmax.f32 %v1210_v35, 0.0  ;;  %v2375_v39 = vadd.f32 %v2374_v32, %v2373_v27 }
 0x1f7   :  { %v2376_v19 = vpop.f32.mrf.mxu1 }
 0x1f8   :  { %v3572_v31 = vpack.c.bf16 %v1334_v41, %v1333_v20  ;;  %v1215_v48 = vadd.f32 %v2375_v39, %v3552_v55  ;;  %2697 = vset.pattern.permute.xlu1 %v2872_v18  ;;  %v2817_v39 = vld [vmem:[%s3973_s3 + $0x20] sm:$0xff]  }
 0x1f9   :  { %v2377_v12 = vpop.f32.mrf.mxu1 }
 0x1fa   :  { %v2378_v61 = vadd.f32 %v2377_v12, %v2376_v19  ;;  %v1335_v58 = vmax.f32 %v1215_v48, 0.0  ;;  %v3618_v19 = vld [vmem:[%s3974_s4 + $0x30] sm:$0xff] }
 0x1fb   :  { %v2379_v57 = vpop.f32.mrf.mxu1  ;;  %1422 = vperm.xlu0 %2694, %v3618_v19  }
 0x1fc   :  { %v1218_v29 = vadd.f32 %v2378_v61, %v3556_v34  ;;  %v2818_v61 = vld [vmem:[%s3973_s3 + $0x28] sm:$0xff]  }
 0x1fd   :  { %v2380_v38 = vpop.f32.mrf.mxu1 }
 0x1fe   :  { %v1336_v21 = vmax.f32 %v1218_v29, 0.0  ;;  %v2381_v42 = vadd.f32 %v2380_v38, %v2379_v57  ;;  %v2794_v29 = vld [vmem:[%s3972_s2 + $0x104] ss:$8 sps:$4 sm:$0xff]  }
 0x1ff   :  { %v2382_v56 = vpop.f32.mrf.mxu1  ;;  %1573 = vmatprep.mubr.bf16.mxu0 %v2794_v29 }
 0x200   :  { %v3582_v60 = vpack.c.bf16 %v1336_v21, %v1335_v58  ;;  %v1223_v34 = vadd.f32 %v2381_v42, %v3535_v44  ;;  %v3635_v58 = vld [vmem:[%s3974_s4 + $0x10] sm:$0xff] }
 0x201   :  { %v2383_v55 = vpop.f32.mrf.mxu1  ;;  %3995 = vst [vmem:[#allocation7_spill] sm:$0xff] %v3635_v58  ;;  %1406 = vperm.xlu0 %2694, %v3635_v58  }
 0x202   :  { %v2384_v26 = vadd.f32 %v2383_v55, %v2382_v56  ;;  %v1337_v62 = vmax.f32 %v1223_v34, 0.0 }
 0x203   :  { %v2385_v1 = vpop.f32.mrf.mxu1 }
 0x204   :  { %v1226_v53 = vadd.f32 %v2384_v26, %v3540_v7  ;;  %v2813_v7 = vld [vmem:[%s3973_s3 + $0x18] sm:$0xff]   ;;  %v2822_v26 = vld [vmem:[%s3973_s3 + $0x30] sm:$0xff]  }
 0x205   :  { %v2386_v44 = vpop.f32.mrf.mxu1  ;;  %2632 = vmatmul.mubr.bf16.gmra.mxu1 %v2813_v7  ;;  %2707 = vset.pattern.permute.xlu0 %v2873_v2 }
 0x206   :  { %v1338_v43 = vmax.f32 %v1226_v53, 0.0  ;;  %v2387_v24 = vadd.f32 %v2386_v44, %v2385_v1  ;;  %2635 = vmatprep.mubr.bf16.mxu1 %v2817_v39  ;;  %1731 = vperm.xlu0 %2707, %v2832_v54   ;;  %v2839_v54 = vld [vmem:[%s3974_s4 + $0x58] sm:$0xff]  ;;  %v2840_v39 = vld [vmem:[%s3974_s4 + $0x40] sm:$0xff] }
 0x207   :  { %v2388_v50 = vpop.f32.mrf.mxu1 }
 0x208   :  { %v3600_v3 = vpack.c.bf16 %v1338_v43, %v1337_v62  ;;  %v1231_v27 = vadd.f32 %v2387_v24, %v3515_v37 }
 0x209   :  { %v2389_v45 = vpop.f32.mrf.mxu1 }
 0x20a   :  { %v2390_v35 = vadd.f32 %v2389_v45, %v2388_v50  ;;  %v1339_v12 = vmax.f32 %v1231_v27, 0.0 }
 0x20b   :  { %v2391_v32 = vpop.f32.mrf.mxu1 }
 0x20c   :  { %v1234_v20 = vadd.f32 %v2390_v35, %v3523_v36  ;;  %v2836_v36 = vld [vmem:[%s3974_s4 + $0x60] sm:$0xff] }
 0x20d   :  { %v2392_v41 = vpop.f32.mrf.mxu1  ;;  %1446 = vperm.xlu1 %2697, %v2836_v36   ;;  %2636 = vmatmul.mubr.bf16.gmra.mxu1 %v2818_v61 }
 0x20e   :  { %v1340_v37 = vmax.f32 %v1234_v20, 0.0  ;;  %v2393_v48 = vadd.f32 %v2392_v41, %v2391_v32  ;;  %2639 = vmatprep.mubr.bf16.mxu1 %v2822_v26  ;;  %1719 = vperm.xlu0 %2707, %v2836_v36  }
 0x20f   :  { %v2394_v57 = vpop.f32.mrf.mxu1 }
 0x210   :  { %v3630_v38 = vpack.c.bf16 %v1340_v37, %v1339_v12  ;;  %v1239_v21 = vadd.f32 %v2393_v48, %v3501_v9  ;;  %v2823_v9 = vld [vmem:[%s3973_s3 + $0x38] sm:$0xff]  }
 0x211   :  { %v2395_v40 = vpop.f32.mrf.mxu1  ;;  %1450 = vperm.xlu1 %2697, %v2838_v52  }
 0x212   :  { %v2396_v42 = vadd.f32 %v2395_v40, %v2394_v57  ;;  %v1341_v1 = vmax.f32 %v1239_v21, 0.0  ;;  %1715 = vperm.xlu0 %2707, %v2839_v54  }
 0x213   :  { %v2397_v56 = vpop.f32.mrf.mxu1 }
 0x214   :  { %v1242_v55 = vadd.f32 %v2396_v42, %v3506_v51  ;;  %v2842_v42 = vld [vmem:[%s3974_s4 + $0x48] sm:$0xff] }
 0x215   :  { %v2398_v34 = vpop.f32.mrf.mxu1  ;;  %2698 = vset.pattern.permute.xlu1 %v2873_v2  ;;  %2640 = vmatmul.mubr.bf16.gmra.mxu1 %v2823_v9 }
 0x216   :  { %v1342_v53 = vmax.f32 %v1242_v55, 0.0  ;;  %v2399_v8 = vadd.f32 %v2398_v34, %v2397_v56  ;;  %1723 = vperm.xlu1 %2698, %v2838_v52   ;;  %1703 = vperm.xlu0 %2707, %v2840_v39   ;;  %v3684_v52 = vld [vmem:[%s3974_s4 + $0x20] sm:$0xff] }
 0x217   :  { %v2400_v44 = vpop.f32.mrf.mxu1 }
 0x218   :  { %v3651_v51 = vpack.c.bf16 %v1342_v53, %v1341_v1  ;;  %v1247_v62 = vadd.f32 %v2399_v8, %v3481_v22  ;;  %v3692_v53 = vld [vmem:[%s3974_s4 + $0x18] sm:$0xff] }
 0x219   :  { %v2401_v49 = vpop.f32.mrf.mxu1  ;;  %3996 = vst [vmem:[#allocation8_spill] sm:$0xff] %v3692_v53 }
 0x21a   :  { %v2402_v43 = vadd.f32 %v2401_v49, %v2400_v44  ;;  %2699 = vset.pattern.permute.xlu1 %v2872_v18  ;;  %v1343_v45 = vmax.f32 %v1247_v62, 0.0  ;;  %v3701_v62 = vld [vmem:[%s3974_s4] sm:$0xff] }
 0x21b   :  { %v2403_v24 = vpop.f32.mrf.mxu1  ;;  %1442 = vperm.xlu1 %2699, %v2839_v54   ;;  %3997 = vst [vmem:[#allocation9_spill] sm:$0xff] %v3701_v62 }
 0x21c   :  { %v1250_v7 = vadd.f32 %v2402_v43, %v3489_v5 }
 0x21d   :  { %v2404_v50 = vpop.f32.mrf.mxu1 }
 0x21e   :  { %v1344_v27 = vmax.f32 %v1250_v7, 0.0  ;;  %v2405_v35 = vadd.f32 %v2404_v50, %v2403_v24 }
 0x21f   :  { %v2406_v32 = vpop.f32.mrf.mxu1  ;;  %2700 = vset.pattern.permute.xlu1 %v2873_v2 }
 0x220   :  { %v3659_v20 = vpack.c.bf16 %v1344_v27, %v1343_v45  ;;  %1711 = vperm.xlu1 %2700, %v3606_v4   ;;  %v1255_v5 = vadd.f32 %v2405_v35, %v3467_v25  ;;  %v3672_v25 = vld [vmem:[%s3974_s4 + $0x38] sm:$0xff] }
 0x221   :  { %v2407_v22 = vpop.f32.mrf.mxu1  ;;  %1699 = vperm.xlu0 %2707, %v3672_v25  }
 0x222   :  { %v2408_v41 = vadd.f32 %v2407_v22, %v2406_v32  ;;  %v1345_v36 = vmax.f32 %v1255_v5, 0.0 }
 0x223   :  { %v2409_v12 = vpop.f32.mrf.mxu1 }
 0x224   :  { %v1258_v37 = vadd.f32 %v2408_v41, %v3472_v14  ;;  %2701 = vset.pattern.permute.xlu1 %v2872_v18 }
 0x225   :  { %v2410_v48 = vpop.f32.mrf.mxu1  ;;  %1430 = vperm.xlu1 %2701, %v2840_v39   ;;  %1687 = vperm.xlu0 %2707, %v3684_v52  }
 0x226   :  { %v1346_v61 = vmax.f32 %v1258_v37, 0.0  ;;  %v2411_v57 = vadd.f32 %v2410_v48, %v2409_v12 }
 0x227   :  { %v2412_v4 = vpop.f32.mrf.mxu1 }
 0x228   :  { %v3675_v29 = vpack.c.bf16 %v1346_v61, %v1345_v36  ;;  %v1263_v14 = vadd.f32 %v2411_v57, %v3447_v47 }
 0x229   :  { %v2413_v40 = vpop.f32.mrf.mxu1  ;;  %1434 = vperm.xlu1 %2701, %v2842_v42   ;;  %1683 = vperm.xlu0 %2707, %v3692_v53  }
 0x22a   :  { %v2414_v21 = vadd.f32 %v2413_v40, %v2412_v4  ;;  %v1347_v26 = vmax.f32 %v1263_v14, 0.0 }
 0x22b   :  { %v2415_v56 = vpop.f32.mrf.mxu1 }
 0x22c   :  { %v1266_v55 = vadd.f32 %v2414_v21, %v3455_v10 }
 0x22d   :  { %v2416_v34 = vpop.f32.mrf.mxu1  ;;  %2702 = vset.pattern.permute.xlu1 %v2873_v2  ;;  %1671 = vperm.xlu0 %2707, %v3701_v62  }
 0x22e   :  { %v1348_v1 = vmax.f32 %v1266_v55, 0.0  ;;  %v2417_v47 = vadd.f32 %v2416_v34, %v2415_v56  ;;  %1707 = vperm.xlu1 %2702, %v2842_v42  }
 0x22f   :  { %v2418_v8 = vpop.f32.mrf.mxu1 }
 0x230   :  { %v3695_v9 = vpack.c.bf16 %v1348_v1, %v1347_v26  ;;  %v1271_v10 = vadd.f32 %v2417_v47, %v3558_v17  ;;  %v3742_v1 = vld [vmem:[%s3974_s4 + $0x8] sm:$0xff] }
 0x231   :  { %v2419_v44 = vpop.f32.mrf.mxu1  ;;  %3998 = vst [vmem:[#allocation10_spill] sm:$0xff] %v3742_v1 }
 0x232   :  { %v2420_v49 = vadd.f32 %v2419_v44, %v2418_v8  ;;  %2703 = vset.pattern.permute.xlu1 %v2872_v18  ;;  %v1349_v54 = vmax.f32 %v1271_v10, 0.0 }
 0x233   :  { %v2421_v43 = vpop.f32.mrf.mxu1  ;;  %1426 = vperm.xlu1 %2703, %v3672_v25  }
 0x234   :  { %v1274_v24 = vadd.f32 %v2420_v49, %v3560_v59 }
 0x235   :  { %v2422_v7 = vpop.f32.mrf.mxu1 }
 0x236   :  { %v1350_v50 = vmax.f32 %v1274_v24, 0.0  ;;  %v2423_v45 = vadd.f32 %v2422_v7, %v2421_v43 }
 0x237   :  { %v2424_v17 = vpop.f32.mrf.mxu1  ;;  %2704 = vset.pattern.permute.xlu1 %v2873_v2 }
 0x238   :  { %v3707_v27 = vpack.c.bf16 %v1350_v50, %v1349_v54  ;;  %1695 = vperm.xlu1 %2704, %v3618_v19   ;;  %v1279_v32 = vadd.f32 %v2423_v45, %v3542_v15  ;;  %v3728_v15 = vld [vmem:[%s3974_s4 + $0x28] sm:$0xff] }
 0x239   :  { %v2425_v35 = vpop.f32.mrf.mxu1 }
 0x23a   :  { %v2426_v22 = vadd.f32 %v2425_v35, %v2424_v17  ;;  %v1351_v39 = vmax.f32 %v1279_v32, 0.0 }
 0x23b   :  { %v3712_v5 = vpop.f32.mrf.mxu1 }
 0x23c   :  { %v1282_v59 = vadd.f32 %v2426_v22, %v3550_v16  ;;  %2705 = vset.pattern.permute.xlu1 %v2872_v18 }
 0x23d   :  { %v3715_v41 = vpop.f32.mrf.mxu1  ;;  %1414 = vperm.xlu1 %2705, %v3684_v52  }
 0x23e   :  { %v1352_v12 = vmax.f32 %v1282_v59, 0.0 }
 0x23f   :  { %v3719_v37 = vpop.f32.mrf.mxu1 }
 0x240   :  { %v3721_v48 = vpack.c.bf16 %v1352_v12, %v1351_v39 }
 0x241   :  { %v3723_v36 = vpop.f32.mrf.mxu1  ;;  %1418 = vperm.xlu1 %2705, %v3728_v15  }
 0x243   :  { %v2433_v16 = vpop.f32.mrf.mxu1 }
 0x245   :  { %v2434_v61 = vpop.f32.mrf.mxu1  ;;  %2706 = vset.pattern.permute.xlu1 %v2873_v2 }
 0x246   :  { %1691 = vperm.xlu1 %2706, %v3728_v15  }
 0x247   :  { %v2436_v57 = vpop.f32.mrf.mxu1 }
 0x249   :  { %v2437_v4 = vpop.f32.mrf.mxu1 }
 0x24a   :  { %2708 = vset.pattern.permute.xlu1 %v2872_v18 }
 0x24b   :  { %v2439_v40 = vpop.f32.mrf.mxu1  ;;  %1410 = vperm.xlu1 %2708, %v3692_v53  }
 0x24d   :  { %v2440_v14 = vpop.f32.mrf.mxu1 }
 0x24f   :  { %v2442_v21 = vpop.f32.mrf.mxu1  ;;  %2709 = vset.pattern.permute.xlu1 %v2873_v2 }
 0x250   :  { %1679 = vperm.xlu1 %2709, %v3635_v58  }
 0x251   :  { %v2443_v42 = vpop.f32.mrf.mxu1 }
 0x252   :  { %v2444_v39 = vadd.f32 %v2443_v42, %v2442_v21 }
 0x253   :  { %v2445_v56 = vpop.f32.mrf.mxu1 }
 0x254   :  { %2710 = vset.pattern.permute.xlu1 %v2872_v18 }
 0x255   :  { %v2446_v55 = vpop.f32.mrf.mxu1  ;;  %1398 = vperm.xlu1 %2710, %v3701_v62  }
 0x256   :  { %v2447_v22 = vadd.f32 %v2446_v55, %v2445_v56 }
 0x257   :  { %v2448_v34 = vpop.f32.mrf.mxu1 }
 0x259   :  { %v2449_v26 = vpop.f32.mrf.mxu1  ;;  %1402 = vperm.xlu1 %2710, %v3742_v1  }
 0x25a   :  { %v2450_v45 = vadd.f32 %v2449_v26, %v2448_v34 }
 0x25b   :  { %v2451_v47 = vpop.f32.mrf.mxu1 }
 0x25c   :  { %v1314_v12 = vadd.f32 %v2450_v45, %v3479_v6 }
 0x25d   :  { %v2452_v8 = vpop.f32.mrf.mxu1  ;;  %2711 = vset.pattern.permute.xlu1 %v2873_v2 }
 0x25e   :  { %1675 = vperm.xlu1 %2711, %v3742_v1   ;;  %v2453_v54 = vadd.f32 %v2452_v8, %v2451_v47  ;;  %v1311_v47 = vadd.f32 %v2447_v22, %v3477_v33  ;;  %v1360_v8 = vmax.f32 %v1314_v12, 0.0 }
 0x25f   :  { %v2454_v44 = vpop.f32.mrf.mxu1 }
 0x260   :  { %v1319_v2 = vadd.f32 %v2453_v54, %v3457_v11  ;;  %v1359_v6 = vmax.f32 %v1311_v47, 0.0  ;;  %v3818_v54 = vpop.permute.xlu1 %1458 }
 0x261   :  { %v2455_v10 = vpop.f32.mrf.mxu1 }
 0x262   :  { %v2456_v43 = vadd.f32 %v2455_v10, %v2454_v44  ;;  %v1361_v34 = vmax.f32 %v1319_v2, 0.0  ;;  %v1394_v21 = vpack.c.bf16 %v1360_v8, %v1359_v6 }
 0x263   :  { %v2457_v18 = vpop.f32.mrf.mxu1 }
 0x264   :  { %v1322_v17 = vadd.f32 %v2456_v43, %v3465_v0  ;;  %v2438_v0 = vadd.f32 %v2437_v4, %v2436_v57  ;;  %v2816_v43 = vld [vmem:[%s3972_s2 + $0x160] ss:$8 sps:$4 sm:$0xff]  }
 0x265   :  { %v2458_v49 = vpop.f32.mrf.mxu1 }
 0x266   :  { %v2459_v24 = vadd.f32 %v2458_v49, %v2457_v18  ;;  %v1362_v1 = vmax.f32 %v1322_v17, 0.0  ;;  %v2441_v18 = vadd.f32 %v2440_v14, %v2439_v40  ;;  %v2432_v40 = vadd.f32 %v3723_v36, %v3719_v37  ;;  %v4000_v37 = vld [vmem:[#allocation6_spill] sm:$0xff] }
 0x267   :  { %v2460_v7 = vpop.f32.mrf.mxu1  ;;  %v1298_v33 = vadd.f32 %v2438_v0, %v3513_v28  ;;  %v2814_v49 = vld [vmem:[%s3972_s2 + $0x164] ss:$8 sps:$4 sm:$0xff]  }
 0x268   :  { %v1327_v35 = vadd.f32 %v2459_v24, %v3445_v30  ;;  %v1306_v30 = vadd.f32 %v2444_v39, %v3499_v23  ;;  %v1395_v56 = vpack.c.bf16 %v1362_v1, %v1361_v34  ;;  %v1303_v11 = vadd.f32 %v2441_v18, %v3491_v13  ;;  %v2811_v1 = vld [vmem:[%s3972_s2 + $0x150] ss:$8 sps:$4 sm:$0xff]   ;;  %v2819_v24 = vld [vmem:[%s3972_s2 + $0x174] ss:$8 sps:$4 sm:$0xff]  }
 0x269   :  { %v2461_v50 = vpop.f32.mrf.mxu1  ;;  %v2429_v23 = vadd.f32 %v3715_v41, %v3712_v5  ;;  %v2808_v41 = vld [vmem:[%s3972_s2 + $0x140] ss:$8 sps:$4 sm:$0xff]  }
 0x26a   :  { %v2462_v32 = vadd.f32 %v2461_v50, %v2460_v7  ;;  %v1363_v44 = vmax.f32 %v1327_v35, 0.0  ;;  %v1358_v14 = vmax.f32 %v1306_v30, 0.0  ;;  %v2821_v7 = vld [vmem:[%s3972_s2 + $0x170] ss:$8 sps:$4 sm:$0xff]  }
 0x26b   :  { %v1287_v36 = vadd.f32 %v2429_v23, %v4000_v37 }
 0x26c   :  { %v1330_v59 = vadd.f32 %v2462_v32, %v3443_v63  ;;  %v2435_v63 = vadd.f32 %v2434_v61, %v2433_v16  ;;  %v3999_v16 = vld [vmem:[#allocation5_spill] sm:$0xff]  ;;  %v1356_v61 = vmax.f32 %v1298_v33, 0.0 }
 0x26d   :  { %v1290_v13 = vadd.f32 %v2432_v40, %v3999_v16 }
 0x26e   :  { %v1364_v10 = vmax.f32 %v1330_v59, 0.0  ;;  %v1295_v57 = vadd.f32 %v2435_v63, %v3511_v46  ;;  %v2792_v46 = vld [vmem:[%s3972_s2 + $0x100] ss:$8 sps:$4 sm:$0xff]   ;;  %v3834_v59 = vpop.permute.xlu0 %1454 }
 0x26f   :  { %v1354_v42 = vmax.f32 %v1290_v13, 0.0  ;;  %v3820_v50 = vpop.permute.xlu1 %1727 }
 0x270   :  { %v1396_v26 = vpack.c.bf16 %v1364_v10, %v1363_v44  ;;  %v1355_v28 = vmax.f32 %v1295_v57, 0.0 }
 0x272   :  { %2463 = vmatprep.subr.bf16.mxu0 %v1396_v26  ;;  %v1392_v55 = vpack.c.bf16 %v1356_v61, %v1355_v28  ;;  %v3838_v12 = vpop.permute.xlu0 %1438 }
 0x273   :  { %2464 = vmatpush3.bf16.msra.mxu0 %v3695_v9  ;;  %v1357_v9 = vmax.f32 %v1303_v11, 0.0  ;;  %v2824_v11 = vld [vmem:[%s3973_s3 + $0x40] sm:$0xff]  }
 0x274   :  { %2465 = vmatprep.subr.bf16.mxu0 %v1395_v56 }
 0x275   :  { %v1393_v4 = vpack.c.bf16 %v1358_v14, %v1357_v9 }
 0x276   :  { %v3842_v10 = vpop.permute.xlu0 %1422 }
 0x277   :  { %2466 = vmatpush3.bf16.msra.mxu0 %v3675_v29  ;;  %v1353_v29 = vmax.f32 %v1287_v36, 0.0 }
 0x278   :  { %2467 = vmatprep.subr.bf16.mxu0 %v1394_v21  ;;  %v2874_v21 = vmov 4  }
 0x279   :  { %v1391_v5 = vpack.c.bf16 %v1354_v42, %v1353_v29  ;;  %2713 = vset.pattern.permute.xlu1 %v2874_v21  ;;  %2712 = vset.pattern.permute.xlu0 %v2874_v21 }
 0x27a   :  { %1956 = vperm.xlu1 %2713, %v3672_v25   ;;  %1952 = vperm.xlu0 %2712, %v3618_v19   ;;  %v4005_v25 = vld [vmem:[#allocation10_spill] sm:$0xff] }
 0x27b   :  { %2468 = vmatpush3.bf16.msra.mxu0 %v3659_v20  ;;  %v2803_v20 = vld [vmem:[%s3972_s2 + $0x130] ss:$8 sps:$4 sm:$0xff]  }
 0x27c   :  { %2469 = vmatprep.subr.bf16.mxu0 %v1393_v4  ;;  %v1407_v47 = vpop.permute.xlu0 %1406 }
 0x27e   :  { %1944 = vperm.xlu1 %2713, %v3684_v52   ;;  %1948 = vperm.xlu0 %2712, %v3728_v15  }
 0x27f   :  { %2470 = vmatpush3.bf16.msra.mxu0 %v3651_v51  ;;  %v2795_v51 = vld [vmem:[%s3972_s2 + $0x114] ss:$8 sps:$4 sm:$0xff]  }
 0x280   :  { %2471 = vmatprep.subr.bf16.mxu0 %v1392_v55 }
 0x281   :  { %v3848_v26 = vpop.permute.xlu0 %1731 }
 0x282   :  { %1936 = vperm.xlu1 %2713, %v3635_v58   ;;  %1940 = vperm.xlu0 %2712, %v3692_v53  }
 0x283   :  { %2472 = vmatpush3.bf16.msra.mxu0 %v3630_v38  ;;  %v2801_v38 = vld [vmem:[%s3972_s2 + $0x134] ss:$8 sps:$4 sm:$0xff]  }
 0x284   :  { %2473 = vmatprep.subr.bf16.mxu0 %v1391_v5 }
 0x286   :  { %1928 = vperm.xlu1 %2713, %v3701_v62   ;;  %1932 = vperm.xlu0 %2712, %v4005_v25  }
 0x287   :  { %2474 = vmatpush3.bf16.msra.mxu0 %v3600_v3  ;;  %v2797_v3 = vld [vmem:[%s3972_s2 + $0x110] ss:$8 sps:$4 sm:$0xff]  }
 0x288   :  { %2475 = vmatprep.subr.bf16.mxu0 %v3721_v48  ;;  %v2809_v48 = vld [vmem:[%s3972_s2 + $0x154] ss:$8 sps:$4 sm:$0xff]   ;;  %v3822_v45 = vpop.permute.xlu1 %1446 }
 0x289   :  { %v3852_v30 = vpop.permute.xlu0 %1719 }
 0x28b   :  { %2476 = vmatpush3.bf16.msra.mxu0 %v3582_v60  ;;  %v2798_v60 = vld [vmem:[%s3972_s2 + $0x124] ss:$8 sps:$4 sm:$0xff]  }
 0x28c   :  { %2477 = vmatprep.subr.bf16.mxu0 %v3707_v27  ;;  %v2806_v27 = vld [vmem:[%s3972_s2 + $0x144] ss:$8 sps:$4 sm:$0xff]   ;;  %v3824_v17 = vpop.permute.xlu1 %1450 }
 0x28d   :  { %v3856_v56 = vpop.permute.xlu0 %1715 }
 0x28f   :  { %2478 = vmatpush3.bf16.msra.mxu0 %v3572_v31  ;;  %v2800_v31 = vld [vmem:[%s3972_s2 + $0x120] ss:$8 sps:$4 sm:$0xff]   ;;  %v2629_v9 = vpop.f32.mrf.mxu1 }
 0x291   :  { %v3826_v35 = vpop.permute.xlu1 %1723  ;;  %v3863_v6 = vpop.permute.xlu0 %1703 }
 0x292   :  { %1574 = vmatmul.mubr.bf16.vlgmr.msra.gmra.mxu0 %v2792_v46  ;;  %v1816_v61 = vpop.f32.mrf.mxu1 }
 0x293   :  { %1581 = vmatprep.mubr.bf16.mxu0 %v2795_v51 }
 0x294   :  { %v2630_v4 = vpop.f32.mrf.mxu1 }
 0x296   :  { %v3828_v32 = vpop.permute.xlu1 %1442  ;;  %v1819_v15 = vpop.f32.mrf.mxu1 }
 0x29a   :  { %1582 = vmatmul.mubr.bf16.gmra.mxu0 %v2797_v3 }
 0x29b   :  { %1589 = vmatprep.mubr.bf16.mxu0 %v2798_v60  ;;  %v3830_v22 = vpop.permute.xlu1 %1711 }
 0x29c   :  { %v3865_v33 = vpop.permute.xlu0 %1699 }
 0x2a0   :  { %v3832_v2 = vpop.permute.xlu1 %1430  ;;  %v3869_v23 = vpop.permute.xlu0 %1687 }
 0x2a1   :  { %4004 = vst [vmem:[#allocation12_spill] sm:$0xff] %v3869_v23 }
 0x2a2   :  { %1590 = vmatmul.mubr.bf16.gmra.mxu0 %v2800_v31 }
 0x2a3   :  { %1597 = vmatprep.mubr.bf16.mxu0 %v2801_v38 }
 0x2a4   :  { %v3836_v39 = vpop.permute.xlu1 %1434  ;;  %v1684_v16 = vpop.permute.xlu0 %1683 }
 0x2a8   :  { %v1672_v37 = vpop.permute.xlu0 %1671 }
 0x2a9   :  { %v3840_v44 = vpop.permute.xlu1 %1707  ;;  %v1817_v5 = vadd.f32 %v1816_v61, %v1672_v37 }
 0x2aa   :  { %1598 = vmatmul.mubr.bf16.gmra.mxu0 %v2803_v20 }
 0x2ab   :  { %1605 = vmatprep.mubr.bf16.mxu0 %v2806_v27  ;;  %v1879_v20 = vmax.f32 %v1817_v5, 0.0 }
 0x2ae   :  { %v3844_v18 = vpop.permute.xlu1 %1426 }
 0x2b2   :  { %1606 = vmatmul.mubr.bf16.gmra.mxu0 %v2808_v41 }
 0x2b3   :  { %1613 = vmatprep.mubr.bf16.mxu0 %v2809_v48  ;;  %v3846_v34 = vpop.permute.xlu1 %1695 }
 0x2b8   :  { %v3850_v0 = vpop.permute.xlu1 %1414 }
 0x2b9   :  { %4001 = vst [vmem:[#allocation5_spill] sm:$0xff] %v3850_v0 }
 0x2ba   :  { %1614 = vmatmul.mubr.bf16.gmra.mxu0 %v2811_v1 }
 0x2bb   :  { %1621 = vmatprep.mubr.bf16.mxu0 %v2814_v49 }
 0x2bc   :  { %v3854_v8 = vpop.permute.xlu1 %1418 }
 0x2bd   :  { %4002 = vst [vmem:[#allocation6_spill] sm:$0xff] %v3854_v8 }
 0x2c1   :  { %v3858_v63 = vpop.permute.xlu1 %1691 }
 0x2c2   :  { %1622 = vmatmul.mubr.bf16.gmra.mxu0 %v2816_v43  ;;  %4003 = vst [vmem:[#allocation11_spill] sm:$0xff] %v3858_v63 }
 0x2c3   :  { %1629 = vmatprep.mubr.bf16.mxu0 %v2819_v24  ;;  %v1828_v24 = vadd.f32 %v2630_v4, %v1684_v16 }
 0x2c6   :  { %v1411_v40 = vpop.permute.xlu1 %1410 }
 0x2ca   :  { %1630 = vmatmul.mubr.bf16.gmra.mxu0 %v2821_v7 }
 0x2cb   :  { %2659 = vmatprep.mubr.bf16.mxu0 %v2824_v11  ;;  %v1680_v14 = vpop.permute.xlu1 %1679 }
 0x2cc   :  { %v1825_v49 = vadd.f32 %v2629_v9, %v1680_v14 }
 0x2d0   :  { %v1399_v57 = vpop.permute.xlu1 %1398 }
 0x2d4   :  { %v1403_v13 = vpop.permute.xlu1 %1402 }
 0x2d9   :  { %v1676_v28 = vpop.permute.xlu1 %1675 }
 0x2da   :  { %v1820_v29 = vadd.f32 %v1819_v15, %v1676_v28  ;;  %v1882_v28 = vmax.f32 %v1828_v24, 0.0 }
 0x2dc   :  { %v1880_v38 = vmax.f32 %v1820_v29, 0.0 }
 0x352   :  { %v2479_v19 = vpop.f32.mrf.mxu0 }
 0x354   :  { %v2480_v36 = vpop.f32.mrf.mxu0 }
 0x355   :  { %v2481_v52 = vadd.f32 %v2480_v36, %v2479_v19 }
 0x356   :  { %v2482_v42 = vpop.f32.mrf.mxu0 }
 0x357   :  { %v1576_v55 = vadd.f32 %v2481_v52, %v1399_v57  ;;  %v3881_v52 = vpop.f32.mrf.mxu1 }
 0x358   :  { %v2483_v46 = vpop.f32.mrf.mxu0 }
 0x359   :  { %v2484_v51 = vadd.f32 %v2483_v46, %v2482_v42  ;;  %v1638_v60 = vmax.f32 %v1576_v55, 0.0  ;;  %v3887_v16 = vpop.f32.mrf.mxu1 }
 0x35a   :  { %v2485_v3 = vpop.f32.mrf.mxu0  ;;  %4007 = vst [vmem:[#allocation14_spill] sm:$0xff] %v3887_v16 }
 0x35b   :  { %v1579_v31 = vadd.f32 %v2484_v51, %v1403_v13  ;;  %v1895_v11 = vadd.f32 %v1879_v20, %v1638_v60  ;;  %v1881_v13 = vmax.f32 %v1825_v49, 0.0 }
 0x35c   :  { %v2486_v27 = vpop.f32.mrf.mxu0 }
 0x35d   :  { %v2487_v41 = vadd.f32 %v2486_v27, %v2485_v3  ;;  %v1639_v48 = vmax.f32 %v1579_v31, 0.0 }
 0x35e   :  { %v2488_v1 = vpop.f32.mrf.mxu0 }
 0x35f   :  { %v1584_v43 = vadd.f32 %v2487_v41, %v1407_v47  ;;  %v1896_v7 = vadd.f32 %v1880_v38, %v1639_v48 }
 0x360   :  { %v2489_v21 = vpop.f32.mrf.mxu0 }
 0x361   :  { %v2490_v57 = vadd.f32 %v2489_v21, %v2488_v1  ;;  %v3877_v19 = vpack.c.bf16 %v1896_v7, %v1895_v11  ;;  %v1640_v37 = vmax.f32 %v1584_v43, 0.0 }
 0x362   :  { %v3879_v61 = vpop.f32.mrf.mxu0 }
 0x363   :  { %4006 = vst [vmem:[#allocation13_spill] sm:$0xff] %v3877_v19  ;;  %v1587_v36 = vadd.f32 %v2490_v57, %v1411_v40  ;;  %v1897_v47 = vadd.f32 %v1881_v13, %v1640_v37  ;;  %v3895_v40 = vpop.f32.mrf.mxu1 }
 0x364   :  { %v3883_v42 = vpop.f32.mrf.mxu0 }
 0x365   :  { %v1641_v15 = vmax.f32 %v1587_v36, 0.0  ;;  %v3899_v51 = vpop.f32.mrf.mxu1 }
 0x366   :  { %v3885_v14 = vpop.f32.mrf.mxu0  ;;  %4009 = vst [vmem:[#allocation16_spill] sm:$0xff] %v3899_v51 }
 0x367   :  { %v1898_v9 = vadd.f32 %v1882_v28, %v1641_v15  ;;  %v2637_v31 = vpop.f32.mrf.mxu1 }
 0x368   :  { %v3889_v4 = vpop.f32.mrf.mxu0 }
 0x369   :  { %v3891_v55 = vpack.c.bf16 %v1898_v9, %v1897_v47  ;;  %v1848_v27 = vpop.f32.mrf.mxu1 }
 0x36a   :  { %v3893_v29 = vpop.f32.mrf.mxu0 }
 0x36b   :  { %4008 = vst [vmem:[#allocation15_spill] sm:$0xff] %v3891_v55  ;;  %v2638_v1 = vpop.f32.mrf.mxu1 }
 0x36c   :  { %v3897_v5 = vpop.f32.mrf.mxu0 }
 0x36d   :  { %v1851_v24 = vpop.f32.mrf.mxu1 }
 0x36e   :  { %v2500_v46 = vpop.f32.mrf.mxu0 }
 0x36f   :  { %v2641_v21 = vpop.f32.mrf.mxu1 }
 0x370   :  { %v2501_v3 = vpop.f32.mrf.mxu0  ;;  %v1873_v19 = vadd.f32 %v2641_v21, %v3820_v50 }
 0x371   :  { %v1864_v37 = vpop.f32.mrf.mxu1 }
 0x372   :  { %v2503_v60 = vpop.f32.mrf.mxu0  ;;  %v1865_v8 = vadd.f32 %v1864_v37, %v3852_v30  ;;  %v1893_v50 = vmax.f32 %v1873_v19, 0.0 }
 0x373   :  { %v2642_v28 = vpop.f32.mrf.mxu1 }
 0x374   :  { %v2504_v38 = vpop.f32.mrf.mxu0  ;;  %v1876_v51 = vadd.f32 %v2642_v28, %v3848_v26  ;;  %v1891_v30 = vmax.f32 %v1865_v8, 0.0  ;;  %v1849_v8 = vadd.f32 %v1848_v27, %v3863_v6  ;;  %v4015_v28 = vld [vmem:[#allocation5_spill] sm:$0xff] }
 0x375   :  { %v1867_v25 = vpop.f32.mrf.mxu1 }
 0x376   :  { %v2506_v20 = vpop.f32.mrf.mxu0  ;;  %v1868_v63 = vadd.f32 %v1867_v25, %v3826_v35  ;;  %v1894_v26 = vmax.f32 %v1876_v51, 0.0  ;;  %v2505_v35 = vadd.f32 %v2504_v38, %v2503_v60  ;;  %v1887_v6 = vmax.f32 %v1849_v8, 0.0 }
 0x378   :  { %v2507_v41 = vpop.f32.mrf.mxu0  ;;  %v1892_v21 = vmax.f32 %v1868_v63, 0.0  ;;  %v1608_v63 = vadd.f32 %v2505_v35, %v3832_v2  ;;  %v1841_v2 = vadd.f32 %v3881_v52, %v3846_v34  ;;  %v4013_v34 = vld [vmem:[#allocation12_spill] sm:$0xff]  ;;  %v4014_v52 = vld [vmem:[#allocation14_spill] sm:$0xff] }
 0x379   :  { %v1833_v37 = vadd.f32 %v4014_v52, %v4013_v34  ;;  %v2827_v35 = vld [vmem:[%s3973_s3 + $0x58] sm:$0xff]  }
 0x37a   :  { %v2509_v48 = vpop.f32.mrf.mxu0 }
 0x37c   :  { %v2510_v49 = vpop.f32.mrf.mxu0 }
 0x37e   :  { %v2512_v43 = vpop.f32.mrf.mxu0 }
 0x380   :  { %v2513_v7 = vpop.f32.mrf.mxu0 }
 0x381   :  { %v2514_v55 = vadd.f32 %v2513_v7, %v2512_v43 }
 0x382   :  { %v2515_v11 = vpop.f32.mrf.mxu0 }
 0x383   :  { %v1619_v43 = vadd.f32 %v2514_v55, %v3828_v32  ;;  %v1852_v32 = vadd.f32 %v1851_v24, %v3840_v44  ;;  %v1844_v44 = vadd.f32 %v3895_v40, %v3865_v33 }
 0x384   :  { %v2516_v57 = vpop.f32.mrf.mxu0 }
 0x385   :  { %v2517_v53 = vadd.f32 %v2516_v57, %v2515_v11  ;;  %v1886_v40 = vmax.f32 %v1844_v44, 0.0 }
 0x386   :  { %v2518_v36 = vpop.f32.mrf.mxu0 }
 0x387   :  { %v1624_v11 = vadd.f32 %v2517_v53, %v3822_v45  ;;  %v2502_v45 = vadd.f32 %v2501_v3, %v2500_v46  ;;  %v1888_v3 = vmax.f32 %v1852_v32, 0.0  ;;  %v4021_v32 = vld [vmem:[#allocation8_spill] sm:$0xff] }
 0x388   :  { %v2519_v13 = vpop.f32.mrf.mxu0 }
 0x389   :  { %v2520_v47 = vadd.f32 %v2519_v13, %v2518_v36  ;;  %v2511_v36 = vadd.f32 %v2510_v49, %v2509_v48  ;;  %v2508_v13 = vadd.f32 %v2507_v41, %v2506_v20  ;;  %v1650_v53 = vmax.f32 %v1624_v11, 0.0  ;;  %v4010_v20 = vld [vmem:[#allocation11_spill] sm:$0xff]  ;;  %v4012_v41 = vld [vmem:[#allocation6_spill] sm:$0xff] }
 0x38a   :  { %v2521_v15 = vpop.f32.mrf.mxu0  ;;  %v1603_v60 = vadd.f32 %v2502_v45, %v3844_v18  ;;  %v4011_v18 = vld [vmem:[#allocation16_spill] sm:$0xff]  ;;  %v4019_v45 = vld [vmem:[#allocation10_spill] sm:$0xff] }
 0x38b   :  { %v1627_v0 = vadd.f32 %v2520_v47, %v3824_v17  ;;  %v1616_v25 = vadd.f32 %v2511_v36, %v3838_v12  ;;  %v1907_v55 = vadd.f32 %v1891_v30, %v1650_v53  ;;  %v1836_v27 = vadd.f32 %v4011_v18, %v4010_v20  ;;  %v4017_v30 = vld [vmem:[#allocation13_spill] sm:$0xff] }
 0x38c   :  { %v2522_v9 = vpop.f32.mrf.mxu0  ;;  %v2875_v53 = vmov 5  }
 0x38d   :  { %v2523_v58 = vadd.f32 %v2522_v9, %v2521_v15  ;;  %v1860_v15 = vadd.f32 %v2638_v1, %v3856_v56  ;;  %v1651_v17 = vmax.f32 %v1627_v0, 0.0  ;;  %v1611_v56 = vadd.f32 %v2508_v13, %v3836_v39  ;;  %2714 = vset.pattern.permute.xlu1 %v2875_v53  ;;  %2715 = vset.pattern.permute.xlu0 %v2875_v53 }
 0x38e   :  { %v2524_v62 = vpop.f32.mrf.mxu0  ;;  %v1649_v0 = vmax.f32 %v1619_v43, 0.0  ;;  %v1648_v12 = vmax.f32 %v1616_v25, 0.0  ;;  %v2496_v39 = vadd.f32 %v3889_v4, %v3885_v14  ;;  %v1646_v4 = vmax.f32 %v1608_v63, 0.0  ;;  %v2828_v25 = vld [vmem:[%s3973_s3 + $0x60] sm:$0xff]   ;;  %2069 = vperm.xlu0 %2715, %v4019_v45  }
 0x38f   :  { %v1632_v16 = vadd.f32 %v2523_v58, %v3834_v59  ;;  %v1857_v59 = vadd.f32 %v2637_v31, %v3830_v22  ;;  %v2499_v22 = vadd.f32 %v3897_v5, %v3893_v29  ;;  %v1647_v31 = vmax.f32 %v1611_v56, 0.0  ;;  %v4020_v56 = vld [vmem:[#allocation7_spill] sm:$0xff] }
 0x390   :  { %v2525_v23 = vpop.f32.mrf.mxu0  ;;  %v2493_v5 = vadd.f32 %v3883_v42, %v3879_v61  ;;  %v1595_v48 = vadd.f32 %v2496_v39, %v4012_v41  ;;  %v1645_v1 = vmax.f32 %v1603_v60, 0.0  ;;  %v1903_v47 = vadd.f32 %v1887_v6, %v1646_v4 }
 0x391   :  { %v2526_v57 = vadd.f32 %v2525_v23, %v2524_v62  ;;  %v1652_v7 = vmax.f32 %v1632_v16, 0.0  ;;  %v1890_v23 = vmax.f32 %v1860_v15, 0.0  ;;  %v1889_v46 = vmax.f32 %v1857_v59, 0.0  ;;  %v4016_v59 = vld [vmem:[#allocation15_spill] sm:$0xff] }
 0x392   :  { %v1600_v14 = vadd.f32 %v2499_v22, %v3842_v10  ;;  %v1904_v49 = vadd.f32 %v1888_v3, %v1647_v31  ;;  %v1592_v61 = vadd.f32 %v2493_v5, %v4015_v28  ;;  %v1885_v10 = vmax.f32 %v1841_v2, 0.0  ;;  %v1957_v22 = vpop.permute.xlu1 %1956 }
 0x393   :  { %v1635_v58 = vadd.f32 %v2526_v57, %v3818_v54  ;;  %v1909_v19 = vadd.f32 %v1893_v50, %v1652_v7  ;;  %v1908_v54 = vadd.f32 %v1892_v21, %v1651_v17  ;;  %v1906_v38 = vadd.f32 %v1890_v23, %v1649_v0  ;;  %v2826_v21 = vld [vmem:[%s3973_s3 + $0x50] sm:$0xff]  }
 0x394   :  { %v1905_v33 = vadd.f32 %v1889_v46, %v1648_v12  ;;  %v1644_v42 = vmax.f32 %v1600_v14, 0.0  ;;  %v1643_v9 = vmax.f32 %v1595_v48, 0.0  ;;  %v1902_v36 = vadd.f32 %v1886_v40, %v1645_v1 }
 0x395   :  { %v1653_v62 = vmax.f32 %v1635_v58, 0.0  ;;  %v1917_v29 = vpack.c.bf16 %v1908_v54, %v1907_v55  ;;  %v1884_v11 = vmax.f32 %v1836_v27, 0.0  ;;  %v1915_v57 = vpack.c.bf16 %v1904_v49, %v1903_v47 }
 0x396   :  { %v1916_v24 = vpack.c.bf16 %v1906_v38, %v1905_v33  ;;  %v1642_v13 = vmax.f32 %v1592_v61, 0.0  ;;  %v1901_v15 = vadd.f32 %v1885_v10, %v1644_v42  ;;  %v1883_v50 = vmax.f32 %v1833_v37, 0.0  ;;  %v2829_v42 = vld [vmem:[%s3973_s3 + $0x68] sm:$0xff]  }
 0x397   :  { %v1910_v16 = vadd.f32 %v1894_v26, %v1653_v62  ;;  %v1900_v43 = vadd.f32 %v1884_v11, %v1643_v9  ;;  %v2825_v26 = vld [vmem:[%s3973_s3 + $0x48] sm:$0xff]   ;;  %v2876_v23 = vmov 6   ;;  %v2877_v0 = vmov 7   ;;  %s2878_s3 = smov [#allocation2]  }
 0x398   :  { %v1914_v17 = vpack.c.bf16 %v1902_v36, %v1901_v15  ;;  %v1899_v7 = vadd.f32 %v1883_v50, %v1642_v13  ;;  %v4018_v62 = vld [vmem:[#allocation9_spill] sm:$0xff]  ;;  %2716 = vset.pattern.permute.xlu0 %v2876_v23  ;;  %s2205_s28 = sshll.u32 %s2878_s3, 4  ;;  %s2206_s28 = int_to_ptr.vmem [resolvable:$true] %s2205_s28 }
 0x399   :  { %v1918_v51 = vpack.c.bf16 %v1910_v16, %v1909_v19  ;;  %2065 = vperm.xlu1 %2714, %v4018_v62   ;;  %2151 = vperm.xlu0 %2716, %v4018_v62   ;;  %v70_v19 = vld [vmem:[%s3974_s4] sm:$0x1]  ;;  %v1953_v16 = vpop.permute.xlu0 %1952  ;;  %s2848_s29 = scalar_lea.vmem %s2206_s28, 16  ;;  %s2852_s30 = scalar_lea.vmem %s2206_s28, 32 }
 0x39a   :  { %v1913_v58 = vpack.c.bf16 %v1900_v43, %v1899_v7  ;;  %p2849_p0 = scmp.ne.s32.totalorder %s2206_s28, %s2848_s29  ;;  %p2853_p1 = scmp.lt.s32.totalorder %s2206_s28, %s2206_s28 }
 0x39b   :  { %2643 = vmatprep.subr.bf16.mxu0 %v1918_v51  ;;  %p2854_p2 = scmp.lt.s32.totalorder %s2852_s30, %s2848_s29 }
 0x39c   :  { %2644 = vmatpush3.bf16.msra.mxu0 %v1918_v51  ;;  %v1945_v51 = vpop.permute.xlu1 %1944 }
 0x39d   :  { %2645 = vmatprep.subr.bf16.mxu0 %v1917_v29  ;;  %2073 = vperm.xlu1 %2714, %v4020_v56   ;;  %v1949_v12 = vpop.permute.xlu0 %1948  ;;  %p2855_p3 = por %p2854_p2, %p2853_p1 }
 0x39e   :  { %2163 = vperm.xlu0 %2716, %v4021_v32  }
 0x39f   :  { %p2856_p4 = pnand %p2855_p3, %p2849_p0 }
 0x3a0   :  { %2646 = vmatpush3.bf16.msra.mxu0 %v1917_v29  ;;  %v1937_v31 = vpop.permute.xlu1 %1936 }
 0x3a1   :  { %2647 = vmatprep.subr.bf16.mxu0 %v1916_v24  ;;  %2077 = vperm.xlu1 %2714, %v4021_v32   ;;  %v1941_v46 = vpop.permute.xlu0 %1940 }
 0x3a2   :  { %2719 = vset.pattern.permute.xlu0 %v2877_v0 }
 0x3a4   :  { %2648 = vmatpush3.bf16.msra.mxu0 %v1916_v24  ;;  %v1929_v41 = vpop.permute.xlu1 %1928 }
 0x3a5   :  { %2649 = vmatprep.subr.bf16.mxu0 %v1915_v57  ;;  %2717 = vset.pattern.permute.xlu1 %v2876_v23  ;;  %v1933_v33 = vpop.permute.xlu0 %1932 }
 0x3a6   :  { %2155 = vperm.xlu1 %2717, %v4019_v45  }
 0x3a8   :  { %2650 = vmatpush3.bf16.msra.mxu0 %v1915_v57 }
 0x3a9   :  { %2651 = vmatprep.subr.bf16.mxu0 %v1914_v17 }
 0x3aa   :  { %2159 = vperm.xlu1 %2717, %v4020_v56  }
 0x3ac   :  { %2652 = vmatpush3.bf16.msra.mxu0 %v1914_v17 }
 0x3ad   :  { %2653 = vmatprep.subr.bf16.mxu0 %v1913_v58 }
 0x3ae   :  { %2718 = vset.pattern.permute.xlu1 %v2877_v0 }
 0x3af   :  { %2186 = vperm.xlu1 %2718, %v70_v19  }
 0x3b0   :  { %2654 = vmatpush3.bf16.msra.mxu0 %v1913_v58 }
 0x3b1   :  { %2655 = vmatprep.subr.bf16.mxu0 %v4016_v59 }
 0x3b4   :  { %2656 = vmatpush3.bf16.msra.mxu0 %v4016_v59 }
 0x3b5   :  { %2657 = vmatprep.subr.bf16.mxu0 %v4017_v30 }
 0x3b8   :  { %2658 = vmatpush3.bf16.msra.mxu0 %v4017_v30 }
 0x3bb   :  { %2660 = vmatmul.mubr.bf16.vlgmr.msra.gmra.mxu0 %v2825_v26 }
 0x3bc   :  { %2663 = vmatprep.mubr.bf16.mxu0 %v2826_v21 }
 0x3c3   :  { %2664 = vmatmul.mubr.bf16.gmra.mxu0 %v2827_v35 }
 0x3c4   :  { %2675 = vmatprep.mubr.msk.bf16.mxu0 %vm2090_vm1, %v2828_v25 }
 0x409   :  { %v2070_v36 = vpop.permute.xlu0 %2069 }
 0x414   :  { %v2066_v10 = vpop.permute.xlu1 %2065  ;;  %v2152_v17 = vpop.permute.xlu0 %2151 }
 0x418   :  { %v2074_v47 = vpop.permute.xlu1 %2073 }
 0x419   :  { %v2164_v62 = vpop.permute.xlu0 %2163 }
 0x41c   :  { %v2078_v9 = vpop.permute.xlu1 %2077 }
 0x421   :  { %v2156_v13 = vpop.permute.xlu1 %2155 }
 0x425   :  { %v2160_v21 = vpop.permute.xlu1 %2159 }
 0x47b   :  { %v2661_v54 = vpop.f32.mrf.mxu0 }
 0x47c   :  { %v2026_v27 = vadd.f32 %v2661_v54, %v1937_v31 }
 0x47d   :  { %v2017_v8 = vpop.f32.mrf.mxu0 }
 0x47e   :  { %v2050_v24 = vmax.f32 %v2026_v27, 0.0  ;;  %v2018_v34 = vadd.f32 %v2017_v8, %v1929_v41 }
 0x47f   :  { %v2662_v63 = vpop.f32.mrf.mxu0 }
 0x480   :  { %v2029_v4 = vadd.f32 %v2662_v63, %v1941_v46  ;;  %v2048_v28 = vmax.f32 %v2018_v34, 0.0 }
 0x481   :  { %v2020_v55 = vpop.f32.mrf.mxu0 }
 0x482   :  { %v2051_v1 = vmax.f32 %v2029_v4, 0.0  ;;  %v2021_v49 = vadd.f32 %v2020_v55, %v1933_v33 }
 0x483   :  { %v2665_v39 = vpop.f32.mrf.mxu0 }
 0x484   :  { %v2042_v3 = vadd.f32 %v2665_v39, %v1953_v16  ;;  %v2061_v52 = vpack.c.bf16 %v2051_v1, %v2050_v24  ;;  %v2049_v37 = vmax.f32 %v2021_v49, 0.0 }
 0x485   :  { %v2033_v44 = vpop.f32.mrf.mxu0 }
 0x486   :  { %v2034_v29 = vadd.f32 %v2033_v44, %v1945_v51  ;;  %v2054_v5 = vmax.f32 %v2042_v3, 0.0  ;;  %v2060_v61 = vpack.c.bf16 %v2049_v37, %v2048_v28  ;;  %v2187_v44 = vpop.permute.xlu1 %2186 }
 0x487   :  { %v2666_v60 = vpop.f32.mrf.mxu0 }
 0x488   :  { %v2045_v38 = vadd.f32 %v2666_v60, %v1957_v22  ;;  %v2052_v20 = vmax.f32 %v2034_v29, 0.0 }
 0x489   :  { %v2036_v2 = vpop.f32.mrf.mxu0 }
 0x48a   :  { %v2055_v6 = vmax.f32 %v2045_v38, 0.0  ;;  %v2037_v14 = vadd.f32 %v2036_v2, %v1949_v12 }
 0x48c   :  { %v2063_v40 = vpack.c.bf16 %v2055_v6, %v2054_v5  ;;  %v2053_v18 = vmax.f32 %v2037_v14, 0.0 }
 0x48e   :  { %v2062_v48 = vpack.c.bf16 %v2053_v18, %v2052_v20  ;;  %2667 = vmatprep.subr.bf16.mxu0 %v2063_v40 }
 0x48f   :  { %2668 = vmatpush3.bf16.msra.mxu0 %v2063_v40 }
 0x490   :  { %2669 = vmatprep.subr.bf16.mxu0 %v2062_v48 }
 0x493   :  { %2670 = vmatpush3.bf16.msra.mxu0 %v2062_v48 }
 0x494   :  { %2671 = vmatprep.subr.bf16.mxu0 %v2061_v52 }
 0x497   :  { %2672 = vmatpush3.bf16.msra.mxu0 %v2061_v52 }
 0x498   :  { %2673 = vmatprep.subr.bf16.mxu0 %v2060_v61 }
 0x49b   :  { %2674 = vmatpush3.bf16.msra.mxu0 %v2060_v61 }
 0x49e   :  { %2676 = vmatmul.mubr.msk.bf16.vlgmr.msra.gmra.mxu0 %vm2090_vm1, %v2829_v42 }
 0x55e   :  { %v2677_v11 = vpop.f32.mrf.mxu0 }
 0x55f   :  { %v2140_v15 = vadd.f32 %v2677_v11, %v2074_v47 }
 0x560   :  { %v2131_v57 = vpop.f32.mrf.mxu0 }
 0x561   :  { %v2132_v50 = vadd.f32 %v2131_v57, %v2066_v10  ;;  %v2148_v30 = vmax.f32 %v2140_v15, 0.0 }
 0x562   :  { %v2678_v43 = vpop.f32.mrf.mxu0 }
 0x563   :  { %v2146_v7 = vmax.f32 %v2132_v50, 0.0  ;;  %v2143_v58 = vadd.f32 %v2678_v43, %v2078_v9  ;;  %v2168_v56 = vmul.f32 %v2160_v21, %v2148_v30 }
 0x564   :  { %v2134_v59 = vpop.f32.mrf.mxu0 }
 0x565   :  { %v2135_v26 = vadd.f32 %v2134_v59, %v2070_v36  ;;  %v2149_v35 = vmax.f32 %v2143_v58, 0.0  ;;  %v2166_v53 = vmul.f32 %v2152_v17, %v2146_v7  ;;  %v2174_v16 = vsel %vm2170_vm2, %v2168_v56, 0.0 }
 0x567   :  { %v2147_v25 = vmax.f32 %v2135_v26, 0.0  ;;  %v2171_v32 = vsel %vm2170_vm2, %v2166_v53, 0.0  ;;  %v2169_v0 = vmul.f32 %v2164_v62, %v2149_v35 }
 0x569   :  { %v2167_v45 = vmul.f32 %v2156_v13, %v2147_v25  ;;  %v2176_v22 = vsel %vm2170_vm2, %v2169_v0, 0.0 }
 0x56b   :  { %v2172_v23 = vsel %vm2170_vm2, %v2167_v45, 0.0 }
 0x56c   :  { %v2173_v19 = vadd.f32 %v2172_v23, %v2171_v32 }
 0x56e   :  { %v2175_v54 = vadd.f32 %v2174_v16, %v2173_v19 }
 0x570   :  { %v2177_v8 = vadd.f32 %v2176_v22, %v2175_v54 }
 0x572   :  { %v2178_v63 = vrot.slane %v2177_v8, 4 }
 0x574   :  { %v2179_v12 = vadd.f32 %v2178_v63, %v2177_v8 }
 0x576   :  { %v2180_v55 = vrot.slane %v2179_v12, 2 }
 0x578   :  { %v2181_v51 = vadd.f32 %v2180_v55, %v2179_v12 }
 0x57a   :  { %v2182_v39 = vrot.slane %v2181_v51, 1 }
 0x57c   :  { %v2183_v46 = vadd.f32 %v2182_v39, %v2181_v51 }
 0x57e   :  { %v2189_v3 = vadd.f32 %v2187_v44, %v2183_v46 }
 0x580   :  { %v2191_v60 = vand.u32 2147483647, %v2189_v3  ;;  %v2190_v38 = vmul.f32 2.0, %v2189_v3 }
 0x582   :  { %v2192_v31 = vadd.f32 1.0, %v2191_v60 }
 0x584   :  { %2830 = vrcp.f32 %v2192_v31 }
 0x591   :  { %v2831_v29 = vpop.eup %2830 }
 0x592   :  { %v2194_v2 = vmul.f32 %v2831_v29, %v2190_v38 }
 0x594   :  { %v2325_v6 = vclamps-f32 %v2194_v2, 2.0 }
 0x596   :  { %2198 = vst.msk [vmem:[#allocation2] sm:$0x1] %vm2197_vm3, %v2325_v6 }
 0x597   :  { %2859 = shalt.err (!%p2856_p4)
}
 0x598   :  { %2208 = dma.vmem_to_hbm [thread:$0]  %s2206_s28, 16, %s3975_s5, [#allocation3]  }
 0x599   :  { %2868 = dma.done.wait [#allocation3], 16  }
 0x59a   :  { %2869 = vsyncadd [#allocation3], 4294967280 }
 0x59b   :  { %2212 = vsyncpa [#allocation3], 1 }

</bundles_post_ra>
